<compile_context>
chip_gen: v5e
topology: v5e:2x2
jax: 0.10.0
libtpu: 0.0.40
codegen_flags: <defaults>
</compile_context>

<pallas_src>
import jax
import jax.numpy as jnp
from jax.experimental import pallas as pl
from jax.experimental.pallas import tpu as pltpu

BOARD_X = 8
BOARD_Y = 8
ACTION_SIZE = 2 * BOARD_X        # pi.view(-1, action_size) -> (B, 2*board_x)
FLAT_IN = BOARD_X * BOARD_Y      # 64
OUT_COLS = ACTION_SIZE + 1       # 16 policy logits + 1 value column

MIN_TILE_B = 16                  # bf16 sublane packing (16,128); also covers f32 (8,128)
MAX_TILE_B = 512                 # batch rows per grid step (comfortable VMEM on all gens)

# dtype for the dominant fc2/fc3 block-diagonal matmuls (operands only; f32 accumulate).
HIDDEN_MATMUL_DTYPE = jnp.bfloat16


def naive_nnet_kernel(x_ref, w1_ref, b1_ref, w2_ref, b2_ref, w3_ref, b3_ref,
                      w45_ref, b45_ref, out_ref):
    # One grid step == one (tile_b, 64) slab of flattened boards.
    # fc1 (block-diag, f32 operands).
    h = jnp.dot(x_ref[...], w1_ref[...], preferred_element_type=jnp.float32) + b1_ref[...]
    h = jnp.maximum(h, 0.0)
    # fc2 / fc3 (block-diag): operands in w*_ref.dtype (bf16 by default), f32 accumulate.
    h = jnp.dot(h.astype(w2_ref.dtype), w2_ref[...],
                preferred_element_type=jnp.float32) + b2_ref[...]
    h = jnp.maximum(h, 0.0)
    h = jnp.dot(h.astype(w3_ref.dtype), w3_ref[...],
                preferred_element_type=jnp.float32) + b3_ref[...]

    # Fused heads: columns [0:16] are the per-batch flattened fc4 logits (exactly
    # torch's pi.view(-1, action_size) layout), column 16 is the fc5 board-row mean.
    y = jnp.dot(h.astype(w45_ref.dtype), w45_ref[...],
                preferred_element_type=jnp.float32) + b45_ref[...]      # (tile_b, 17)

    pi = y[:, :ACTION_SIZE]                                             # (tile_b, 16)
    v = y[:, ACTION_SIZE:]                                              # (tile_b, 1)

    # Per-batch-element log_softmax over the 16 logits.
    m = jnp.max(pi, axis=-1, keepdims=True)
    lse = m + jnp.log(jnp.sum(jnp.exp(pi - m), axis=-1, keepdims=True))

    out_ref[:, :ACTION_SIZE] = pi - lse
    out_ref[:, ACTION_SIZE:] = jnp.tanh(v)


def init_params(key):
    """Deterministic torch-Linear-style init, weights stored as (in, out)."""
    def linear(key, fan_in, fan_out):
        kw, kb = jax.random.split(key)
        bound = 1.0 / jnp.sqrt(float(fan_in))
        w = jax.random.uniform(kw, (fan_in, fan_out), jnp.float32, -bound, bound)
        b = jax.random.uniform(kb, (1, fan_out), jnp.float32, -bound, bound)
        return w, b

    k1, k2, k3, k4, k5 = jax.random.split(key, 5)
    w1, b1 = linear(k1, BOARD_Y, 32)
    w2, b2 = linear(k2, 32, 128)
    w3, b3 = linear(k3, 128, 32)
    w4, b4 = linear(k4, 32, 2)
    w5, b5 = linear(k5, 32, 1)
    return (w1, b1, w2, b2, w3, b3, w4, b4, w5, b5)


def fold_params(params, hidden_dtype=HIDDEN_MATMUL_DTYPE):
    """One-time (init-time) folding: per-row MLP -> block-diagonal weights on the
    flattened board; fc4/fc5 fused into one 17-column head with the board-row mean
    baked into the fc5 column. Dominant fc2/fc3 weights are cast to `hidden_dtype`."""
    w1, b1, w2, b2, w3, b3, w4, b4, w5, b5 = params
    eye = jnp.eye(BOARD_X, dtype=jnp.float32)
    w1b = jnp.kron(eye, w1)                          # (64, 256)
    w2b = jnp.kron(eye, w2)                          # (256, 1024)
    w3b = jnp.kron(eye, w3)                          # (1024, 256)
    w4b = jnp.kron(eye, w4)                          # (256, 16)  pi in view(-1, 16) order
    w5b = jnp.tile(w5, (BOARD_X, 1)) / BOARD_X       # (256, 1)   mean over rows folded in
    w45 = jnp.concatenate([w4b, w5b], axis=1)        # (256, 17)
    b1b = jnp.tile(b1, (1, BOARD_X))                 # (1, 256)
    b2b = jnp.tile(b2, (1, BOARD_X))                 # (1, 1024)
    b3b = jnp.tile(b3, (1, BOARD_X))                 # (1, 256)
    b45 = jnp.concatenate([jnp.tile(b4, (1, BOARD_X)), b5], axis=1)   # (1, 17)
    return (w1b.astype(jnp.float32), b1b.astype(jnp.float32),
            w2b.astype(hidden_dtype), b2b.astype(jnp.float32),
            w3b.astype(hidden_dtype), b3b.astype(jnp.float32),
            w45.astype(jnp.float32), b45.astype(jnp.float32))


def _round_up(x, m):
    return ((x + m - 1) // m) * m


def _cdiv(a, b):
    return (a + b - 1) // b


@jax.jit
def naive_nnet_forward(s, folded):
    """s: (..., board_x, board_y) (or anything reshapable to (-1, 64)).
    folded: output of fold_params(). Returns (log_pi (B,16), v (B,))."""
    x = s.reshape(-1, FLAT_IN).astype(jnp.float32)   # (B, 64) lane-dense input
    B = x.shape[0]

    # Adaptive batch tiling: <= MAX_TILE_B rows/step, padding waste <= MIN_TILE_B-1 rows.
    b_al = _round_up(max(B, MIN_TILE_B), MIN_TILE_B)
    n_tiles = _cdiv(b_al, MAX_TILE_B)
    tile_b = _round_up(_cdiv(b_al, n_tiles), MIN_TILE_B)
    b_pad = tile_b * n_tiles
    if b_pad != B:
        x = jnp.pad(x, ((0, b_pad - B), (0, 0)))
    grid = (b_pad // tile_b,)

    w1b, b1b, w2b, b2b, w3b, b3b, w45, b45 = folded

    def const_spec(arr):
        n = arr.ndim
        return pl.BlockSpec(arr.shape, lambda i, _n=n: (0,) * _n)

    out = pl.pallas_call(
        naive_nnet_kernel,
        grid=grid,
        in_specs=[
            pl.BlockSpec((tile_b, FLAT_IN), lambda i: (i, 0)),
            const_spec(w1b), const_spec(b1b),
            const_spec(w2b), const_spec(b2b),
            const_spec(w3b), const_spec(b3b),
            const_spec(w45), const_spec(b45),
        ],
        out_specs=pl.BlockSpec((tile_b, OUT_COLS), lambda i: (i, 0)),
        out_shape=jax.ShapeDtypeStruct((b_pad, OUT_COLS), jnp.float32),
        compiler_params=pltpu.CompilerParams(dimension_semantics=("parallel",)),
    )(x, w1b, b1b, w2b, b2b, w3b, b3b, w45, b45)

    log_pi = out[:B, :ACTION_SIZE]     # == torch pi.view(-1, action_size) after log_softmax
    value = out[:B, ACTION_SIZE]       # (B,)
    return log_pi, value


def reference_forward(s, params):
    """Plain-JAX f32 reference mirroring the PyTorch module exactly."""
    w1, b1, w2, b2, w3, b3, w4, b4, w5, b5 = params
    x = s.reshape(-1, BOARD_X, BOARD_Y).astype(jnp.float32)
    h = jax.nn.relu(x @ w1 + b1)
    h = jax.nn.relu(h @ w2 + b2)
    h = h @ w3 + b3
    pi = (h @ w4 + b4).reshape(-1, ACTION_SIZE)
    pi = jax.nn.log_softmax(pi, axis=1)
    v = (h @ w5 + b5).reshape(-1, BOARD_X).mean(axis=1)
    return pi, jnp.tanh(v)


if __name__ == "__main__":
    key = jax.random.PRNGKey(0)
    k_params, k_small, k_big = jax.random.split(key, 3)
    params = init_params(k_params)

    # Fold weights ONCE (hoisted out of the per-call path per perf review).
    folded_bf16 = fold_params(params, hidden_dtype=HIDDEN_MATMUL_DTYPE)   # fast path
    folded_f32 = fold_params(params, hidden_dtype=jnp.float32)            # exactness check

    s_small = jax.random.normal(k_small, (2, BOARD_X, BOARD_Y), jnp.float32)
    s_big = jax.random.normal(k_big, (1040, BOARD_X, BOARD_Y), jnp.float32)

    ref_pi_s, ref_v_s = reference_forward(s_small, params)
    ref_pi_b, ref_v_b = reference_forward(s_big, params)

    # --- f32 path: structural correctness at tight tolerance ---
    pi_f, v_f = naive_nnet_forward(s_small, folded_f32)
    jax.block_until_ready((pi_f, v_f))
    assert pi_f.shape == (2, ACTION_SIZE) and v_f.shape == (2,)
    assert jnp.allclose(pi_f, ref_pi_s, atol=1e-4, rtol=1e-4)
    assert jnp.allclose(v_f, ref_v_s, atol=1e-4, rtol=1e-4)

    # --- bf16 fast path (fc2/fc3 on the MXU in bf16, f32 accumulate): relaxed tolerance ---
    pi_s, v_s = naive_nnet_forward(s_small, folded_bf16)
    jax.block_until_ready((pi_s, v_s))
    assert jnp.allclose(pi_s, ref_pi_s, atol=2e-2, rtol=2e-2)
    assert jnp.allclose(v_s, ref_v_s, atol=2e-2, rtol=2e-2)

    # Larger batch exercises the multi-tile grid (3 tiles of 352) + minimal padding (1056).
    pi_b, v_b = naive_nnet_forward(s_big, folded_bf16)
    jax.block_until_ready((pi_b, v_b))
    assert pi_b.shape == (1040, ACTION_SIZE) and v_b.shape == (1040,)
    assert jnp.allclose(pi_b, ref_pi_b, atol=2e-2, rtol=2e-2)
    assert jnp.allclose(v_b, ref_v_b, atol=2e-2, rtol=2e-2)

    print("KERNEL_OK")
</pallas_src>

<mosaic_0001>
module attributes {stable_mosaic.version = 11 : i64} {
  func.func @naive_nnet_kernel(%arg0: i32, %arg1: memref<16x64xf32, #tpu.memory_space<vmem>>, %arg2: memref<64x256xf32, #tpu.memory_space<vmem>>, %arg3: memref<1x256xf32, #tpu.memory_space<vmem>>, %arg4: memref<256x1024xf32, #tpu.memory_space<vmem>>, %arg5: memref<1x1024xf32, #tpu.memory_space<vmem>>, %arg6: memref<1024x256xf32, #tpu.memory_space<vmem>>, %arg7: memref<1x256xf32, #tpu.memory_space<vmem>>, %arg8: memref<256x17xf32, #tpu.memory_space<vmem>>, %arg9: memref<1x17xf32, #tpu.memory_space<vmem>>, %arg10: memref<16x17xf32, #tpu.memory_space<vmem>>) attributes {dimension_semantics = [#tpu.dimension_semantics<parallel>], iteration_bounds = array<i64: 1>, scalar_prefetch = 0 : i64, scratch_operands = 0 : i64, tpu.core_type = #tpu.core_type<tc>, window_params = [{transform_indices = @transform_0, window_bounds = array<i64: 16, 64>}, {pipeline_mode = #tpu.pipeline_mode<synchronous>, transform_indices = @transform_1, window_bounds = array<i64: 64, 256>}, {pipeline_mode = #tpu.pipeline_mode<synchronous>, transform_indices = @transform_2, window_bounds = array<i64: 1, 256>}, {pipeline_mode = #tpu.pipeline_mode<synchronous>, transform_indices = @transform_3, window_bounds = array<i64: 256, 1024>}, {pipeline_mode = #tpu.pipeline_mode<synchronous>, transform_indices = @transform_4, window_bounds = array<i64: 1, 1024>}, {pipeline_mode = #tpu.pipeline_mode<synchronous>, transform_indices = @transform_5, window_bounds = array<i64: 1024, 256>}, {pipeline_mode = #tpu.pipeline_mode<synchronous>, transform_indices = @transform_6, window_bounds = array<i64: 1, 256>}, {pipeline_mode = #tpu.pipeline_mode<synchronous>, transform_indices = @transform_7, window_bounds = array<i64: 256, 17>}, {pipeline_mode = #tpu.pipeline_mode<synchronous>, transform_indices = @transform_8, window_bounds = array<i64: 1, 17>}, {transform_indices = @transform_9, window_bounds = array<i64: 16, 17>}]} {
    %c0 = arith.constant 0 : index
    %c0_0 = arith.constant 0 : index
    %0 = vector.load %arg1[%c0, %c0_0] : memref<16x64xf32, #tpu.memory_space<vmem>>, vector<16x64xf32>
    %c0_1 = arith.constant 0 : index
    %c0_2 = arith.constant 0 : index
    %1 = vector.load %arg2[%c0_1, %c0_2] : memref<64x256xf32, #tpu.memory_space<vmem>>, vector<64x256xf32>
    %cst = arith.constant dense<0.000000e+00> : vector<16x256xf32>
    %2 = tpu.matmul %0, %1, %cst {dimension_numbers = #tpu.dot_dimension_numbers<[1], [0], [0], [1], [0, 0, 1, 1], [], []>} : vector<16x64xf32>, vector<64x256xf32>, vector<16x256xf32> -> vector<16x256xf32>
    %c0_3 = arith.constant 0 : index
    %c0_4 = arith.constant 0 : index
    %3 = vector.load %arg3[%c0_3, %c0_4] : memref<1x256xf32, #tpu.memory_space<vmem>>, vector<1x256xf32>
    %4 = vector.broadcast %3 : vector<1x256xf32> to vector<16x256xf32>
    %5 = arith.addf %2, %4 : vector<16x256xf32>
    %cst_5 = arith.constant 0.000000e+00 : f32
    %6 = vector.broadcast %cst_5 : f32 to vector<16x256xf32>
    %7 = arith.maximumf %5, %6 : vector<16x256xf32>
    %c0_6 = arith.constant 0 : index
    %c0_7 = arith.constant 0 : index
    %8 = vector.load %arg4[%c0_6, %c0_7] : memref<256x1024xf32, #tpu.memory_space<vmem>>, vector<256x1024xf32>
    %cst_8 = arith.constant dense<0.000000e+00> : vector<16x1024xf32>
    %9 = tpu.matmul %7, %8, %cst_8 {dimension_numbers = #tpu.dot_dimension_numbers<[1], [0], [0], [1], [0, 0, 1, 1], [], []>} : vector<16x256xf32>, vector<256x1024xf32>, vector<16x1024xf32> -> vector<16x1024xf32>
    %c0_9 = arith.constant 0 : index
    %c0_10 = arith.constant 0 : index
    %10 = vector.load %arg5[%c0_9, %c0_10] : memref<1x1024xf32, #tpu.memory_space<vmem>>, vector<1x1024xf32>
    %11 = vector.broadcast %10 : vector<1x1024xf32> to vector<16x1024xf32>
    %12 = arith.addf %9, %11 : vector<16x1024xf32>
    %cst_11 = arith.constant 0.000000e+00 : f32
    %13 = vector.broadcast %cst_11 : f32 to vector<16x1024xf32>
    %14 = arith.maximumf %12, %13 : vector<16x1024xf32>
    %c0_12 = arith.constant 0 : index
    %c0_13 = arith.constant 0 : index
    %15 = vector.load %arg6[%c0_12, %c0_13] : memref<1024x256xf32, #tpu.memory_space<vmem>>, vector<1024x256xf32>
    %cst_14 = arith.constant dense<0.000000e+00> : vector<16x256xf32>
    %16 = tpu.matmul %14, %15, %cst_14 {dimension_numbers = #tpu.dot_dimension_numbers<[1], [0], [0], [1], [0, 0, 1, 1], [], []>} : vector<16x1024xf32>, vector<1024x256xf32>, vector<16x256xf32> -> vector<16x256xf32>
    %c0_15 = arith.constant 0 : index
    %c0_16 = arith.constant 0 : index
    %17 = vector.load %arg7[%c0_15, %c0_16] : memref<1x256xf32, #tpu.memory_space<vmem>>, vector<1x256xf32>
    %18 = vector.broadcast %17 : vector<1x256xf32> to vector<16x256xf32>
    %19 = arith.addf %16, %18 : vector<16x256xf32>
    %c0_17 = arith.constant 0 : index
    %c0_18 = arith.constant 0 : index
    %20 = vector.load %arg8[%c0_17, %c0_18] : memref<256x17xf32, #tpu.memory_space<vmem>>, vector<256x17xf32>
    %cst_19 = arith.constant dense<0.000000e+00> : vector<16x17xf32>
    %21 = tpu.matmul %19, %20, %cst_19 {dimension_numbers = #tpu.dot_dimension_numbers<[1], [0], [0], [1], [0, 0, 1, 1], [], []>} : vector<16x256xf32>, vector<256x17xf32>, vector<16x17xf32> -> vector<16x17xf32>
    %c0_20 = arith.constant 0 : index
    %c0_21 = arith.constant 0 : index
    %22 = vector.load %arg9[%c0_20, %c0_21] : memref<1x17xf32, #tpu.memory_space<vmem>>, vector<1x17xf32>
    %23 = vector.broadcast %22 : vector<1x17xf32> to vector<16x17xf32>
    %24 = arith.addf %21, %23 : vector<16x17xf32>
    %25 = vector.extract_strided_slice %24 {offsets = [0, 0], sizes = [16, 16], strides = [1, 1]} : vector<16x17xf32> to vector<16x16xf32>
    %26 = vector.extract_strided_slice %24 {offsets = [0, 16], sizes = [16, 1], strides = [1, 1]} : vector<16x17xf32> to vector<16x1xf32>
    %cst_22 = arith.constant dense<0xFF800000> : vector<16xf32>
    %27 = vector.multi_reduction <maximumf>, %25, %cst_22 [1] : vector<16x16xf32> to vector<16xf32>
    %28 = vector.shape_cast %27 : vector<16xf32> to vector<16x1xf32>
    %29 = vector.broadcast %28 : vector<16x1xf32> to vector<16x16xf32>
    %30 = arith.subf %25, %29 : vector<16x16xf32>
    %31 = math.exp %30 : vector<16x16xf32>
    %cst_23 = arith.constant dense<0.000000e+00> : vector<16xf32>
    %32 = vector.multi_reduction <add>, %31, %cst_23 [1] : vector<16x16xf32> to vector<16xf32>
    %33 = vector.shape_cast %32 : vector<16xf32> to vector<16x1xf32>
    %34 = math.log %33 : vector<16x1xf32>
    %35 = arith.addf %28, %34 : vector<16x1xf32>
    %36 = vector.broadcast %35 : vector<16x1xf32> to vector<16x16xf32>
    %37 = arith.subf %25, %36 : vector<16x16xf32>
    %c0_24 = arith.constant 0 : index
    %c0_25 = arith.constant 0 : index
    %38 = vector.load %arg10[%c0_24, %c0_25] : memref<16x17xf32, #tpu.memory_space<vmem>>, vector<16x16xf32>
    tpu.vector_store %arg10[%c0_24, %c0_25], %37 {strides = array<i32>} : memref<16x17xf32, #tpu.memory_space<vmem>>, vector<16x16xf32>,
    %39 = math.tanh %26 : vector<16x1xf32>
    %c0_26 = arith.constant 0 : index
    %c16 = arith.constant 16 : index
    %40 = vector.load %arg10[%c0_26, %c16] : memref<16x17xf32, #tpu.memory_space<vmem>>, vector<16x1xf32>
    tpu.vector_store %arg10[%c0_26, %c16], %39 {strides = array<i32>} : memref<16x17xf32, #tpu.memory_space<vmem>>, vector<16x1xf32>,
    return
  }
  func.func @transform_0(%arg0: i32) -> (i32, i32) {
    %c0_i32 = arith.constant 0 : i32
    %c0_i32_0 = arith.constant 0 : i32
    return %arg0, %c0_i32 : i32, i32
  }
  func.func @transform_1(%arg0: i32) -> (i32, i32) {
    %c0_i32 = arith.constant 0 : i32
    %c0_i32_0 = arith.constant 0 : i32
    %c0_i32_1 = arith.constant 0 : i32
    return %c0_i32, %c0_i32_0 : i32, i32
  }
  func.func @transform_2(%arg0: i32) -> (i32, i32) {
    %c0_i32 = arith.constant 0 : i32
    %c0_i32_0 = arith.constant 0 : i32
    %c0_i32_1 = arith.constant 0 : i32
    return %c0_i32, %c0_i32_0 : i32, i32
  }
  func.func @transform_3(%arg0: i32) -> (i32, i32) {
    %c0_i32 = arith.constant 0 : i32
    %c0_i32_0 = arith.constant 0 : i32
    %c0_i32_1 = arith.constant 0 : i32
    return %c0_i32, %c0_i32_0 : i32, i32
  }
  func.func @transform_4(%arg0: i32) -> (i32, i32) {
    %c0_i32 = arith.constant 0 : i32
    %c0_i32_0 = arith.constant 0 : i32
    %c0_i32_1 = arith.constant 0 : i32
    return %c0_i32, %c0_i32_0 : i32, i32
  }
  func.func @transform_5(%arg0: i32) -> (i32, i32) {
    %c0_i32 = arith.constant 0 : i32
    %c0_i32_0 = arith.constant 0 : i32
    %c0_i32_1 = arith.constant 0 : i32
    return %c0_i32, %c0_i32_0 : i32, i32
  }
  func.func @transform_6(%arg0: i32) -> (i32, i32) {
    %c0_i32 = arith.constant 0 : i32
    %c0_i32_0 = arith.constant 0 : i32
    %c0_i32_1 = arith.constant 0 : i32
    return %c0_i32, %c0_i32_0 : i32, i32
  }
  func.func @transform_7(%arg0: i32) -> (i32, i32) {
    %c0_i32 = arith.constant 0 : i32
    %c0_i32_0 = arith.constant 0 : i32
    %c0_i32_1 = arith.constant 0 : i32
    return %c0_i32, %c0_i32_0 : i32, i32
  }
  func.func @transform_8(%arg0: i32) -> (i32, i32) {
    %c0_i32 = arith.constant 0 : i32
    %c0_i32_0 = arith.constant 0 : i32
    %c0_i32_1 = arith.constant 0 : i32
    return %c0_i32, %c0_i32_0 : i32, i32
  }
  func.func @transform_9(%arg0: i32) -> (i32, i32) {
    %c0_i32 = arith.constant 0 : i32
    %c0_i32_0 = arith.constant 0 : i32
    return %arg0, %c0_i32 : i32, i32
  }
}

</mosaic_0001>

<bundles_post_ra>
// kernel: naive_nnet_forward.1
= control target key start
LH: loop header
LB: loop body
LE: loop exit
PB: predicated region body
PF: predicated region fallthrough
CT: control target
= control target key end

     0   :  { %14 = vsyncpa [#allocation3], 0  ;;  %s2047_s0 = inlined_call_operand.vmem [shape: f32[16,64], index: 0, kind: input, shape index: {}]   ;;  %s2048_s1 = inlined_call_operand.vmem [shape: f32[64,256], index: 1, kind: input, shape index: {}]   ;;  %s2049_s2 = inlined_call_operand.vmem [shape: f32[1,256], index: 2, kind: input, shape index: {}]   ;;  %s2050_s3 = inlined_call_operand.hbm [shape: f32[256,1024], index: 3, kind: input, shape index: {}]   ;;  %s2051_s4 = inlined_call_operand.vmem [shape: f32[1,1024], index: 4, kind: input, shape index: {}]   ;;  %s2052_s5 = inlined_call_operand.hbm [shape: f32[1024,256], index: 5, kind: input, shape index: {}]   ;;  %s2053_s6 = inlined_call_operand.vmem [shape: f32[1,256], index: 6, kind: input, shape index: {}]   ;;  %s2054_s7 = inlined_call_operand.vmem [shape: f32[256,17], index: 7, kind: input, shape index: {}]   ;;  %s2055_s8 = inlined_call_operand.vmem [shape: f32[1,17], index: 8, kind: input, shape index: {}]   ;;  %s2056_s9 = inlined_call_operand.vmem [shape: f32[16,17], index: 9, kind: output, shape index: {}]  }
   0x1   :  { %s26_s11 = sshll.u32 %s2050_s3, 4  ;;  %s27_s11 = int_to_ptr.hbm [resolvable:$true] %s26_s11 }
   0x2   :  { %15 = vsyncpa [#allocation5], 0  ;;  %s1630_s12 = smov [#allocation2]   ;;  %s41_s16 = sshll.u32 %s2052_s5, 4  ;;  %s42_s16 = int_to_ptr.hbm [resolvable:$true] %s41_s16 }
   0x3   :  { %s28_s13 = sshll.u32 %s1630_s12, 4  ;;  %s1631_s17 = smov 1024   ;;  %s29_s13 = int_to_ptr.vmem [resolvable:$true] %s28_s13 }
   0x4   :  { %s1632_s18 = smov 64   ;;  %s1633_s19 = smov [#allocation4]  }
   0x5   :  { %34 = dma.hbm_to_vmem [thread:$0]  %s27_s11, 32768, %s29_s13, [#allocation3], %s1631_s17, %s1631_s17, %s1632_s18  }
   0x6   :  { %s43_s20 = sshll.u32 %s1633_s19, 4  ;;  %s1634_s21 = smov 256   ;;  %s44_s20 = int_to_ptr.vmem [resolvable:$true] %s43_s20 }
   0x7   :  { %s1635_s22 = smov 16  }
   0x8   :  { %49 = dma.hbm_to_vmem [thread:$0]  %s42_s16, 32768, %s44_s20, [#allocation5], %s1634_s21, %s1634_s21, %s1635_s22  }
   0x9   :  { %1626 = dma.done.wait [#allocation3], 32768  }
   0xa   :  { %1627 = vsyncadd [#allocation3], 4294934528 }
   0xb   :  { %1628 = dma.done.wait [#allocation5], 32768  }
   0xc   :  { %1629 = vsyncadd [#allocation5], 4294934528  ;;  %v80_v0 = vld [vmem:[%s2048_s1 + $0x70] sm:$0xff]  ;;  %v81_v1 = vld [vmem:[%s2048_s1 + $0x78] sm:$0xff]  ;;  %vm88_vm0 = vcmask 523264   ;;  %vm1515_vm1 = vcmask 130048  }
   0xd   :  { %v78_v2 = vld [vmem:[%s2048_s1 + $0x60] sm:$0xff]  ;;  %103 = vmatpush.msra.mxu0 %v80_v0  ;;  %126 = vmatpush.msra.mxu1 %v81_v1  ;;  %v79_v3 = vld [vmem:[%s2048_s1 + $0x68] sm:$0xff]  ;;  %v76_v4 = vld [vmem:[%s2048_s1 + $0x50] sm:$0xff]  ;;  %vm1546_vm2 = vcmask 138368  }
   0xe   :  { %v77_v5 = vld [vmem:[%s2048_s1 + $0x58] sm:$0xff]  ;;  %v74_v6 = vld [vmem:[%s2048_s1 + $0x40] sm:$0xff]  ;;  %v75_v7 = vld [vmem:[%s2048_s1 + $0x48] sm:$0xff] }
   0xf   :  { %104 = vmatpush.msra.mxu0 %v78_v2  ;;  %127 = vmatpush.msra.mxu1 %v79_v3  ;;  %v72_v8 = vld [vmem:[%s2048_s1 + $0x30] sm:$0xff]  ;;  %v73_v9 = vld [vmem:[%s2048_s1 + $0x38] sm:$0xff]  ;;  %v265_v10 = vld [vmem:[#allocation2 + $0x3c0] sm:$0xff] }
  0x10   :  { %v393_v11 = vld [vmem:[#allocation2 + $0x7c0] sm:$0xff]  ;;  %v71_v15 = vld [vmem:[%s2048_s1 + $0x28] sm:$0xff]  ;;  %419 = vmatpush.msra.mxu2 %v265_v10  ;;  %v68_v18 = vld [vmem:[%s2048_s1 + $0x10] sm:$0xff] }
  0x11   :  { %105 = vmatpush.msra.mxu0 %v76_v4  ;;  %128 = vmatpush.msra.mxu1 %v77_v5  ;;  %v257_v12 = vld [vmem:[#allocation2 + $0x380] sm:$0xff]  ;;  %v69_v19 = vld [vmem:[%s2048_s1 + $0x18] sm:$0xff]  ;;  %v67_v23 = vld [vmem:[%s2048_s1 + $0x8] sm:$0xff] }
  0x12   :  { %v385_v13 = vld [vmem:[#allocation2 + $0x780] sm:$0xff]  ;;  %442 = vmatpush.msra.mxu3 %v393_v11  ;;  %420 = vmatpush.msra.mxu2 %v257_v12  ;;  %v266_v25 = vld [vmem:[#allocation2 + $0x3c8] sm:$0xff] }
  0x13   :  { %106 = vmatpush.msra.mxu0 %v74_v6  ;;  %129 = vmatpush.msra.mxu1 %v75_v7  ;;  %v70_v14 = vld [vmem:[%s2048_s1 + $0x20] sm:$0xff]  ;;  %v394_v26 = vld [vmem:[#allocation2 + $0x7c8] sm:$0xff] }
  0x14   :  { %v249_v16 = vld [vmem:[#allocation2 + $0x340] sm:$0xff]  ;;  %443 = vmatpush.msra.mxu3 %v385_v13  ;;  %v258_v29 = vld [vmem:[#allocation2 + $0x388] sm:$0xff] }
  0x15   :  { %107 = vmatpush.msra.mxu0 %v72_v8  ;;  %130 = vmatpush.msra.mxu1 %v73_v9  ;;  %v377_v17 = vld [vmem:[#allocation2 + $0x740] sm:$0xff]  ;;  %v386_v30 = vld [vmem:[#allocation2 + $0x788] sm:$0xff] }
  0x16   :  { %v241_v20 = vld [vmem:[#allocation2 + $0x300] sm:$0xff]  ;;  %421 = vmatpush.msra.mxu2 %v249_v16  ;;  %444 = vmatpush.msra.mxu3 %v377_v17  ;;  %v250_v33 = vld [vmem:[#allocation2 + $0x348] sm:$0xff] }
  0x17   :  { %108 = vmatpush.msra.mxu0 %v70_v14  ;;  %131 = vmatpush.msra.mxu1 %v71_v15  ;;  %v369_v21 = vld [vmem:[#allocation2 + $0x700] sm:$0xff]  ;;  %v378_v34 = vld [vmem:[#allocation2 + $0x748] sm:$0xff]  ;;  %v267_v14 = vld [vmem:[#allocation2 + $0x3d0] sm:$0xff] }
  0x18   :  { %v66_v22 = vld [vmem:[%s2048_s1] sm:$0xff]  ;;  %422 = vmatpush.msra.mxu2 %v241_v20  ;;  %445 = vmatpush.msra.mxu3 %v369_v21  ;;  %v242_v37 = vld [vmem:[#allocation2 + $0x308] sm:$0xff]  ;;  %v395_v15 = vld [vmem:[#allocation2 + $0x7d0] sm:$0xff] }
  0x19   :  { %109 = vmatpush.msra.mxu0 %v68_v18  ;;  %132 = vmatpush.msra.mxu1 %v69_v19  ;;  %v64_v24 = vld [vmem:[%s2047_s0] sm:$0xff]  ;;  %v370_v38 = vld [vmem:[#allocation2 + $0x708] sm:$0xff]  ;;  %v259_v18 = vld [vmem:[#allocation2 + $0x390] sm:$0xff] }
  0x1a   :  { %v233_v27 = vld [vmem:[#allocation2 + $0x2c0] sm:$0xff]  ;;  %v65_v39 = vld [vmem:[%s2047_s0 + $0x8] sm:$0xff]  ;;  %v387_v19 = vld [vmem:[#allocation2 + $0x790] sm:$0xff] }
  0x1b   :  { %110 = vmatpush.msra.mxu0 %v66_v22  ;;  %133 = vmatpush.msra.mxu1 %v67_v23  ;;  %v361_v28 = vld [vmem:[#allocation2 + $0x6c0] sm:$0xff]  ;;  %v234_v40 = vld [vmem:[#allocation2 + $0x2c8] sm:$0xff]  ;;  %v268_v22 = vld [vmem:[#allocation2 + $0x3d8] sm:$0xff] }
  0x1c   :  { %1555 = vmatmul.msk.f32.vlgmr.msra.gmra.mxu0 %vm88_vm0, %v64_v24  ;;  %1557 = vmatmul.msk.f32.vlgmr.msra.gmra.mxu1 %vm88_vm0, %v64_v24  ;;  %v225_v31 = vld [vmem:[#allocation2 + $0x280] sm:$0xff]  ;;  %v362_v41 = vld [vmem:[#allocation2 + $0x6c8] sm:$0xff]  ;;  %v396_v23 = vld [vmem:[#allocation2 + $0x7d8] sm:$0xff] }
  0x1d   :  { %465 = vmatpush.msrb.mxu0 %v266_v25  ;;  %488 = vmatpush.msrb.mxu1 %v394_v26  ;;  %v353_v32 = vld [vmem:[#allocation2 + $0x680] sm:$0xff]  ;;  %v226_v44 = vld [vmem:[#allocation2 + $0x288] sm:$0xff]  ;;  %v251_v24 = vld [vmem:[#allocation2 + $0x350] sm:$0xff] }
  0x1e   :  { %423 = vmatpush.msra.mxu2 %v233_v27  ;;  %446 = vmatpush.msra.mxu3 %v361_v28  ;;  %v217_v35 = vld [vmem:[#allocation2 + $0x240] sm:$0xff]  ;;  %v354_v45 = vld [vmem:[#allocation2 + $0x688] sm:$0xff]  ;;  %v379_v25 = vld [vmem:[#allocation2 + $0x750] sm:$0xff] }
  0x1f   :  { %466 = vmatpush.msrb.mxu0 %v258_v29  ;;  %489 = vmatpush.msrb.mxu1 %v386_v30  ;;  %v345_v36 = vld [vmem:[#allocation2 + $0x640] sm:$0xff]  ;;  %v218_v48 = vld [vmem:[#allocation2 + $0x248] sm:$0xff]  ;;  %v260_v26 = vld [vmem:[#allocation2 + $0x398] sm:$0xff] }
  0x20   :  { %424 = vmatpush.msra.mxu2 %v225_v31  ;;  %447 = vmatpush.msra.mxu3 %v353_v32  ;;  %v209_v42 = vld [vmem:[#allocation2 + $0x200] sm:$0xff]  ;;  %v346_v49 = vld [vmem:[#allocation2 + $0x648] sm:$0xff]  ;;  %v388_v27 = vld [vmem:[#allocation2 + $0x798] sm:$0xff] }
  0x21   :  { %467 = vmatpush.msrb.mxu0 %v250_v33  ;;  %490 = vmatpush.msrb.mxu1 %v378_v34  ;;  %v337_v43 = vld [vmem:[#allocation2 + $0x600] sm:$0xff]  ;;  %v210_v52 = vld [vmem:[#allocation2 + $0x208] sm:$0xff]  ;;  %v243_v28 = vld [vmem:[#allocation2 + $0x310] sm:$0xff] }
  0x22   :  { %425 = vmatpush.msra.mxu2 %v217_v35  ;;  %448 = vmatpush.msra.mxu3 %v345_v36  ;;  %v201_v46 = vld [vmem:[#allocation2 + $0x1c0] sm:$0xff]  ;;  %v338_v53 = vld [vmem:[#allocation2 + $0x608] sm:$0xff]  ;;  %v371_v29 = vld [vmem:[#allocation2 + $0x710] sm:$0xff] }
  0x23   :  { %468 = vmatpush.msrb.mxu0 %v242_v37  ;;  %491 = vmatpush.msrb.mxu1 %v370_v38  ;;  %v329_v47 = vld [vmem:[#allocation2 + $0x5c0] sm:$0xff]  ;;  %v202_v56 = vld [vmem:[#allocation2 + $0x1c8] sm:$0xff]  ;;  %v252_v30 = vld [vmem:[#allocation2 + $0x358] sm:$0xff] }
  0x24   :  { %1556 = vmatmul.msk.f32.gmra.mxu0 %vm88_vm0, %v65_v39  ;;  %1558 = vmatmul.msk.f32.gmra.mxu1 %vm88_vm0, %v65_v39  ;;  %v193_v50 = vld [vmem:[#allocation2 + $0x180] sm:$0xff]  ;;  %v330_v57 = vld [vmem:[#allocation2 + $0x5c8] sm:$0xff]  ;;  %v380_v31 = vld [vmem:[#allocation2 + $0x758] sm:$0xff] }
  0x25   :  { %469 = vmatpush.msrb.mxu0 %v234_v40  ;;  %492 = vmatpush.msrb.mxu1 %v362_v41  ;;  %v321_v51 = vld [vmem:[#allocation2 + $0x580] sm:$0xff]  ;;  %v194_v60 = vld [vmem:[#allocation2 + $0x188] sm:$0xff]  ;;  %v235_v32 = vld [vmem:[#allocation2 + $0x2d0] sm:$0xff] }
  0x26   :  { %426 = vmatpush.msra.mxu2 %v209_v42  ;;  %449 = vmatpush.msra.mxu3 %v337_v43  ;;  %v185_v54 = vld [vmem:[#allocation2 + $0x140] sm:$0xff]  ;;  %v322_v61 = vld [vmem:[#allocation2 + $0x588] sm:$0xff]  ;;  %v363_v33 = vld [vmem:[#allocation2 + $0x6d0] sm:$0xff] }
  0x27   :  { %470 = vmatpush.msrb.mxu0 %v226_v44  ;;  %493 = vmatpush.msrb.mxu1 %v354_v45  ;;  %v313_v55 = vld [vmem:[#allocation2 + $0x540] sm:$0xff]  ;;  %v186_v0 = vld [vmem:[#allocation2 + $0x148] sm:$0xff]  ;;  %v244_v34 = vld [vmem:[#allocation2 + $0x318] sm:$0xff] }
  0x28   :  { %427 = vmatpush.msra.mxu2 %v201_v46  ;;  %450 = vmatpush.msra.mxu3 %v329_v47  ;;  %v177_v58 = vld [vmem:[#allocation2 + $0x100] sm:$0xff]  ;;  %v314_v1 = vld [vmem:[#allocation2 + $0x548] sm:$0xff]  ;;  %v372_v35 = vld [vmem:[#allocation2 + $0x718] sm:$0xff] }
  0x29   :  { %471 = vmatpush.msrb.mxu0 %v218_v48  ;;  %494 = vmatpush.msrb.mxu1 %v346_v49  ;;  %v305_v59 = vld [vmem:[#allocation2 + $0x500] sm:$0xff]  ;;  %v178_v4 = vld [vmem:[#allocation2 + $0x108] sm:$0xff]  ;;  %v227_v36 = vld [vmem:[#allocation2 + $0x290] sm:$0xff] }
  0x2a   :  { %428 = vmatpush.msra.mxu2 %v193_v50  ;;  %451 = vmatpush.msra.mxu3 %v321_v51  ;;  %v169_v62 = vld [vmem:[#allocation2 + $0xc0] sm:$0xff]  ;;  %v306_v5 = vld [vmem:[#allocation2 + $0x508] sm:$0xff]  ;;  %v355_v37 = vld [vmem:[#allocation2 + $0x690] sm:$0xff] }
  0x2b   :  { %472 = vmatpush.msrb.mxu0 %v210_v52  ;;  %495 = vmatpush.msrb.mxu1 %v338_v53  ;;  %v297_v63 = vld [vmem:[#allocation2 + $0x4c0] sm:$0xff]  ;;  %v170_v8 = vld [vmem:[#allocation2 + $0xc8] sm:$0xff]  ;;  %v236_v38 = vld [vmem:[#allocation2 + $0x2d8] sm:$0xff] }
  0x2c   :  { %429 = vmatpush.msra.mxu2 %v185_v54  ;;  %452 = vmatpush.msra.mxu3 %v313_v55  ;;  %v161_v2 = vld [vmem:[#allocation2 + $0x80] sm:$0xff]  ;;  %v298_v9 = vld [vmem:[#allocation2 + $0x4c8] sm:$0xff]  ;;  %v364_v39 = vld [vmem:[#allocation2 + $0x6d8] sm:$0xff] }
  0x2d   :  { %473 = vmatpush.msrb.mxu0 %v202_v56  ;;  %496 = vmatpush.msrb.mxu1 %v330_v57  ;;  %v289_v3 = vld [vmem:[#allocation2 + $0x480] sm:$0xff]  ;;  %v162_v12 = vld [vmem:[#allocation2 + $0x88] sm:$0xff]  ;;  %v219_v40 = vld [vmem:[#allocation2 + $0x250] sm:$0xff] }
  0x2e   :  { %430 = vmatpush.msra.mxu2 %v177_v58  ;;  %453 = vmatpush.msra.mxu3 %v305_v59  ;;  %v153_v6 = vld [vmem:[#allocation2 + $0x40] sm:$0xff]  ;;  %v290_v13 = vld [vmem:[#allocation2 + $0x488] sm:$0xff]  ;;  %v347_v41 = vld [vmem:[#allocation2 + $0x650] sm:$0xff] }
  0x2f   :  { %474 = vmatpush.msrb.mxu0 %v194_v60  ;;  %497 = vmatpush.msrb.mxu1 %v322_v61  ;;  %v281_v7 = vld [vmem:[#allocation2 + $0x440] sm:$0xff]  ;;  %v154_v16 = vld [vmem:[#allocation2 + $0x48] sm:$0xff]  ;;  %v228_v42 = vld [vmem:[#allocation2 + $0x298] sm:$0xff] }
  0x30   :  { %431 = vmatpush.msra.mxu2 %v169_v62  ;;  %454 = vmatpush.msra.mxu3 %v297_v63  ;;  %v145_v10 = vld [vmem:[#allocation2] sm:$0xff]  ;;  %v282_v17 = vld [vmem:[#allocation2 + $0x448] sm:$0xff]  ;;  %v356_v43 = vld [vmem:[#allocation2 + $0x698] sm:$0xff] }
  0x31   :  { %475 = vmatpush.msrb.mxu0 %v186_v0  ;;  %498 = vmatpush.msrb.mxu1 %v314_v1  ;;  %v273_v11 = vld [vmem:[#allocation2 + $0x400] sm:$0xff]  ;;  %v146_v20 = vld [vmem:[#allocation2 + $0x8] sm:$0xff]  ;;  %v211_v44 = vld [vmem:[#allocation2 + $0x210] sm:$0xff] }
  0x32   :  { %432 = vmatpush.msra.mxu2 %v161_v2  ;;  %455 = vmatpush.msra.mxu3 %v289_v3  ;;  %v274_v21 = vld [vmem:[#allocation2 + $0x408] sm:$0xff]  ;;  %v339_v45 = vld [vmem:[#allocation2 + $0x610] sm:$0xff]  ;;  %v220_v46 = vld [vmem:[#allocation2 + $0x258] sm:$0xff] }
  0x33   :  { %476 = vmatpush.msrb.mxu0 %v178_v4  ;;  %499 = vmatpush.msrb.mxu1 %v306_v5  ;;  %v348_v47 = vld [vmem:[#allocation2 + $0x658] sm:$0xff]  ;;  %v203_v48 = vld [vmem:[#allocation2 + $0x1d0] sm:$0xff] }
  0x34   :  { %433 = vmatpush.msra.mxu2 %v153_v6  ;;  %456 = vmatpush.msra.mxu3 %v281_v7  ;;  %v331_v49 = vld [vmem:[#allocation2 + $0x5d0] sm:$0xff]  ;;  %v212_v50 = vld [vmem:[#allocation2 + $0x218] sm:$0xff] }
  0x35   :  { %477 = vmatpush.msrb.mxu0 %v170_v8  ;;  %500 = vmatpush.msrb.mxu1 %v298_v9  ;;  %v340_v51 = vld [vmem:[#allocation2 + $0x618] sm:$0xff]  ;;  %v195_v52 = vld [vmem:[#allocation2 + $0x190] sm:$0xff] }
  0x36   :  { %434 = vmatpush.msra.mxu2 %v145_v10  ;;  %457 = vmatpush.msra.mxu3 %v273_v11  ;;  %v323_v53 = vld [vmem:[#allocation2 + $0x590] sm:$0xff]  ;;  %v204_v54 = vld [vmem:[#allocation2 + $0x1d8] sm:$0xff] }
  0x37   :  { %478 = vmatpush.msrb.mxu0 %v162_v12  ;;  %501 = vmatpush.msrb.mxu1 %v290_v13  ;;  %v332_v55 = vld [vmem:[#allocation2 + $0x5d8] sm:$0xff]  ;;  %v187_v56 = vld [vmem:[#allocation2 + $0x150] sm:$0xff] }
  0x38   :  { %511 = vmatpush.msrb.mxu2 %v267_v14  ;;  %534 = vmatpush.msrb.mxu3 %v395_v15  ;;  %v315_v57 = vld [vmem:[#allocation2 + $0x550] sm:$0xff]  ;;  %v196_v58 = vld [vmem:[#allocation2 + $0x198] sm:$0xff] }
  0x39   :  { %479 = vmatpush.msrb.mxu0 %v154_v16  ;;  %502 = vmatpush.msrb.mxu1 %v282_v17  ;;  %v324_v59 = vld [vmem:[#allocation2 + $0x598] sm:$0xff]  ;;  %v179_v60 = vld [vmem:[#allocation2 + $0x110] sm:$0xff] }
  0x3a   :  { %512 = vmatpush.msrb.mxu2 %v259_v18  ;;  %535 = vmatpush.msrb.mxu3 %v387_v19  ;;  %v307_v61 = vld [vmem:[#allocation2 + $0x510] sm:$0xff]  ;;  %v188_v62 = vld [vmem:[#allocation2 + $0x158] sm:$0xff]  ;;  %v82_v18 = vld [vmem:[%s2049_s2] sm:$0x3] }
  0x3b   :  { %480 = vmatpush.msrb.mxu0 %v146_v20  ;;  %503 = vmatpush.msrb.mxu1 %v274_v21  ;;  %v316_v63 = vld [vmem:[#allocation2 + $0x558] sm:$0xff]  ;;  %v171_v0 = vld [vmem:[#allocation2 + $0xd0] sm:$0xff]  ;;  %v84_v19 = vperm.slane %v82_v18, 0  ;;  %v85_v20 = vperm.slane %v82_v18, 1  ;;  %v301_v18 = vld [vmem:[#allocation2 + $0x4e0] sm:$0xff] }
  0x3c   :  { %513 = vmatpush.msrb.mxu2 %v251_v24  ;;  %536 = vmatpush.msrb.mxu3 %v379_v25  ;;  %v299_v1 = vld [vmem:[#allocation2 + $0x4d0] sm:$0xff]  ;;  %v180_v2 = vld [vmem:[#allocation2 + $0x118] sm:$0xff] }
  0x3d   :  { %557 = vmatpush.msra.mxu0 %v268_v22  ;;  %580 = vmatpush.msra.mxu1 %v396_v23  ;;  %v308_v3 = vld [vmem:[#allocation2 + $0x518] sm:$0xff]  ;;  %v163_v6 = vld [vmem:[#allocation2 + $0x90] sm:$0xff] }
  0x3e   :  { %514 = vmatpush.msrb.mxu2 %v243_v28  ;;  %537 = vmatpush.msrb.mxu3 %v371_v29  ;;  %v172_v4 = vld [vmem:[#allocation2 + $0xd8] sm:$0xff]  ;;  %v291_v7 = vld [vmem:[#allocation2 + $0x490] sm:$0xff]  ;;  %v397_v28 = vld [vmem:[#allocation2 + $0x7e0] sm:$0xff] }
  0x3f   :  { %558 = vmatpush.msra.mxu0 %v260_v26  ;;  %581 = vmatpush.msra.mxu1 %v388_v27  ;;  %v300_v5 = vld [vmem:[#allocation2 + $0x4d8] sm:$0xff]  ;;  %v155_v10 = vld [vmem:[#allocation2 + $0x50] sm:$0xff]  ;;  %v269_v27 = vld [vmem:[#allocation2 + $0x3e0] sm:$0xff] }
  0x40   :  { %515 = vmatpush.msrb.mxu2 %v235_v32  ;;  %538 = vmatpush.msrb.mxu3 %v363_v33  ;;  %v164_v8 = vld [vmem:[#allocation2 + $0x98] sm:$0xff]  ;;  %v283_v11 = vld [vmem:[#allocation2 + $0x450] sm:$0xff]  ;;  %v270_v29 = vld [vmem:[#allocation2 + $0x3e8] sm:$0xff] }
  0x41   :  { %559 = vmatpush.msra.mxu0 %v252_v30  ;;  %582 = vmatpush.msra.mxu1 %v380_v31  ;;  %v292_v9 = vld [vmem:[#allocation2 + $0x498] sm:$0xff]  ;;  %v147_v14 = vld [vmem:[#allocation2 + $0x10] sm:$0xff]  ;;  %v398_v30 = vld [vmem:[#allocation2 + $0x7e8] sm:$0xff] }
  0x42   :  { %516 = vmatpush.msrb.mxu2 %v227_v36  ;;  %539 = vmatpush.msrb.mxu3 %v355_v37  ;;  %v156_v12 = vld [vmem:[#allocation2 + $0x58] sm:$0xff]  ;;  %v275_v15 = vld [vmem:[#allocation2 + $0x410] sm:$0xff]  ;;  %v261_v31 = vld [vmem:[#allocation2 + $0x3a0] sm:$0xff] }
  0x43   :  { %560 = vmatpush.msra.mxu0 %v244_v34  ;;  %583 = vmatpush.msra.mxu1 %v372_v35  ;;  %v284_v13 = vld [vmem:[#allocation2 + $0x458] sm:$0xff]  ;;  %v389_v32 = vld [vmem:[#allocation2 + $0x7a0] sm:$0xff]  ;;  %v262_v33 = vld [vmem:[#allocation2 + $0x3a8] sm:$0xff] }
  0x44   :  { %517 = vmatpush.msrb.mxu2 %v219_v40  ;;  %540 = vmatpush.msrb.mxu3 %v347_v41  ;;  %v148_v16 = vld [vmem:[#allocation2 + $0x18] sm:$0xff]  ;;  %v390_v34 = vld [vmem:[#allocation2 + $0x7a8] sm:$0xff]  ;;  %v253_v37 = vld [vmem:[#allocation2 + $0x360] sm:$0xff] }
  0x45   :  { %561 = vmatpush.msra.mxu0 %v236_v38  ;;  %584 = vmatpush.msra.mxu1 %v364_v39  ;;  %v276_v17 = vld [vmem:[#allocation2 + $0x418] sm:$0xff]  ;;  %v381_v38 = vld [vmem:[#allocation2 + $0x760] sm:$0xff]  ;;  %v254_v41 = vld [vmem:[#allocation2 + $0x368] sm:$0xff] }
  0x46   :  { %518 = vmatpush.msrb.mxu2 %v211_v44  ;;  %541 = vmatpush.msrb.mxu3 %v339_v45  ;;  %v373_v44 = vld [vmem:[#allocation2 + $0x720] sm:$0xff] }
  0x47   :  { %562 = vmatpush.msra.mxu0 %v228_v42  ;;  %585 = vmatpush.msra.mxu1 %v356_v43  ;;  %v382_v42 = vld [vmem:[#allocation2 + $0x768] sm:$0xff]  ;;  %v245_v43 = vld [vmem:[#allocation2 + $0x320] sm:$0xff] }
  0x48   :  { %519 = vmatpush.msrb.mxu2 %v203_v48  ;;  %542 = vmatpush.msrb.mxu3 %v331_v49  ;;  %v374_v48 = vld [vmem:[#allocation2 + $0x728] sm:$0xff]  ;;  %v237_v49 = vld [vmem:[#allocation2 + $0x2e0] sm:$0xff] }
  0x49   :  { %563 = vmatpush.msra.mxu0 %v220_v46  ;;  %586 = vmatpush.msra.mxu1 %v348_v47  ;;  %v246_v47 = vld [vmem:[#allocation2 + $0x328] sm:$0xff] }
  0x4a   :  { %520 = vmatpush.msrb.mxu2 %v195_v52  ;;  %543 = vmatpush.msrb.mxu3 %v323_v53  ;;  %v366_v52 = vld [vmem:[#allocation2 + $0x6e8] sm:$0xff]  ;;  %v229_v53 = vld [vmem:[#allocation2 + $0x2a0] sm:$0xff] }
  0x4b   :  { %564 = vmatpush.msra.mxu0 %v212_v50  ;;  %587 = vmatpush.msra.mxu1 %v340_v51  ;;  %v365_v50 = vld [vmem:[#allocation2 + $0x6e0] sm:$0xff]  ;;  %v238_v51 = vld [vmem:[#allocation2 + $0x2e8] sm:$0xff] }
  0x4c   :  { %521 = vmatpush.msrb.mxu2 %v187_v56  ;;  %544 = vmatpush.msrb.mxu3 %v315_v57  ;;  %v358_v56 = vld [vmem:[#allocation2 + $0x6a8] sm:$0xff]  ;;  %v221_v57 = vld [vmem:[#allocation2 + $0x260] sm:$0xff] }
  0x4d   :  { %565 = vmatpush.msra.mxu0 %v204_v54  ;;  %588 = vmatpush.msra.mxu1 %v332_v55  ;;  %v357_v54 = vld [vmem:[#allocation2 + $0x6a0] sm:$0xff]  ;;  %v230_v55 = vld [vmem:[#allocation2 + $0x2a8] sm:$0xff] }
  0x4e   :  { %522 = vmatpush.msrb.mxu2 %v179_v60  ;;  %545 = vmatpush.msrb.mxu3 %v307_v61  ;;  %v350_v60 = vld [vmem:[#allocation2 + $0x668] sm:$0xff]  ;;  %v213_v61 = vld [vmem:[#allocation2 + $0x220] sm:$0xff] }
  0x4f   :  { %566 = vmatpush.msra.mxu0 %v196_v58  ;;  %589 = vmatpush.msra.mxu1 %v324_v59  ;;  %v349_v58 = vld [vmem:[#allocation2 + $0x660] sm:$0xff]  ;;  %v222_v59 = vld [vmem:[#allocation2 + $0x268] sm:$0xff] }
  0x50   :  { %523 = vmatpush.msrb.mxu2 %v171_v0  ;;  %546 = vmatpush.msrb.mxu3 %v299_v1  ;;  %v342_v0 = vld [vmem:[#allocation2 + $0x628] sm:$0xff]  ;;  %v205_v1 = vld [vmem:[#allocation2 + $0x1e0] sm:$0xff] }
  0x51   :  { %567 = vmatpush.msra.mxu0 %v188_v62  ;;  %590 = vmatpush.msra.mxu1 %v316_v63  ;;  %v341_v62 = vld [vmem:[#allocation2 + $0x620] sm:$0xff]  ;;  %v214_v63 = vld [vmem:[#allocation2 + $0x228] sm:$0xff] }
  0x52   :  { %524 = vmatpush.msrb.mxu2 %v163_v6  ;;  %547 = vmatpush.msrb.mxu3 %v291_v7  ;;  %v325_v6 = vld [vmem:[#allocation2 + $0x5a0] sm:$0xff]  ;;  %v198_v7 = vld [vmem:[#allocation2 + $0x1a8] sm:$0xff] }
  0x53   :  { %568 = vmatpush.msra.mxu0 %v180_v2  ;;  %591 = vmatpush.msra.mxu1 %v308_v3  ;;  %v333_v2 = vld [vmem:[#allocation2 + $0x5e0] sm:$0xff]  ;;  %v206_v3 = vld [vmem:[#allocation2 + $0x1e8] sm:$0xff] }
  0x54   :  { %525 = vmatpush.msrb.mxu2 %v155_v10  ;;  %548 = vmatpush.msrb.mxu3 %v283_v11  ;;  %v317_v10 = vld [vmem:[#allocation2 + $0x560] sm:$0xff]  ;;  %v190_v11 = vld [vmem:[#allocation2 + $0x168] sm:$0xff] }
  0x55   :  { %569 = vmatpush.msra.mxu0 %v172_v4  ;;  %592 = vmatpush.msra.mxu1 %v300_v5  ;;  %v334_v4 = vld [vmem:[#allocation2 + $0x5e8] sm:$0xff]  ;;  %v197_v5 = vld [vmem:[#allocation2 + $0x1a0] sm:$0xff] }
  0x56   :  { %526 = vmatpush.msrb.mxu2 %v147_v14  ;;  %549 = vmatpush.msrb.mxu3 %v275_v15  ;;  %v309_v14 = vld [vmem:[#allocation2 + $0x520] sm:$0xff]  ;;  %v182_v15 = vld [vmem:[#allocation2 + $0x128] sm:$0xff] }
  0x57   :  { %570 = vmatpush.msra.mxu0 %v164_v8  ;;  %593 = vmatpush.msra.mxu1 %v292_v9  ;;  %v326_v8 = vld [vmem:[#allocation2 + $0x5a8] sm:$0xff]  ;;  %v189_v9 = vld [vmem:[#allocation2 + $0x160] sm:$0xff] }
  0x59   :  { %571 = vmatpush.msra.mxu0 %v156_v12  ;;  %594 = vmatpush.msra.mxu1 %v284_v13  ;;  %v318_v12 = vld [vmem:[#allocation2 + $0x568] sm:$0xff]  ;;  %v181_v13 = vld [vmem:[#allocation2 + $0x120] sm:$0xff] }
  0x5b   :  { %572 = vmatpush.msra.mxu0 %v148_v16  ;;  %595 = vmatpush.msra.mxu1 %v276_v17  ;;  %v310_v16 = vld [vmem:[#allocation2 + $0x528] sm:$0xff]  ;;  %v173_v17 = vld [vmem:[#allocation2 + $0xe0] sm:$0xff] }
  0x99   :  { %v112_v21 = vpop.f32.mrf.mxu0  ;;  %v135_v22 = vpop.f32.mrf.mxu1 }
  0x9a   :  { %v113_v23 = vadd.f32 %v112_v21, %v84_v19  ;;  %v136_v24 = vadd.f32 %v135_v22, %v85_v20  ;;  %v165_v21 = vld [vmem:[#allocation2 + $0xa0] sm:$0xff] }
  0x9b   :  { %v293_v22 = vld [vmem:[#allocation2 + $0x4a0] sm:$0xff] }
  0x9c   :  { %v1753_v25 = vmax.f32 %v113_v23, 0.0  ;;  %v1755_v26 = vmax.f32 %v136_v24, 0.0  ;;  %v166_v23 = vld [vmem:[#allocation2 + $0xa8] sm:$0xff] }
  0x9d   :  { %v294_v24 = vld [vmem:[#allocation2 + $0x4a8] sm:$0xff] }
  0x9e   :  { %435 = vmatmul.f32.vlgmr.msra.gmra.mxu2 %v1753_v25  ;;  %458 = vmatmul.f32.vlgmr.msra.gmra.mxu3 %v1755_v26 }
  0x9f   :  { %481 = vmatmul.f32.vlgmr.msrb.gmra.mxu0 %v1753_v25  ;;  %504 = vmatmul.f32.vlgmr.msrb.gmra.mxu1 %v1755_v26 }
  0xa0   :  { %603 = vmatpush.msra.mxu2 %v269_v27  ;;  %626 = vmatpush.msra.mxu3 %v397_v28  ;;  %v157_v27 = vld [vmem:[#allocation2 + $0x60] sm:$0xff] }
  0xa1   :  { %649 = vmatpush.msrb.mxu0 %v270_v29  ;;  %672 = vmatpush.msrb.mxu1 %v398_v30  ;;  %v115_v35 = vpop.f32.mrf.mxu0  ;;  %v138_v36 = vpop.f32.mrf.mxu1  ;;  %v285_v28 = vld [vmem:[#allocation2 + $0x460] sm:$0xff]  ;;  %v158_v29 = vld [vmem:[#allocation2 + $0x68] sm:$0xff] }
  0xa2   :  { %604 = vmatpush.msra.mxu2 %v261_v31  ;;  %627 = vmatpush.msra.mxu3 %v389_v32  ;;  %v116_v39 = vadd.f32 %v115_v35, %v84_v19  ;;  %v139_v40 = vadd.f32 %v138_v36, %v85_v20  ;;  %v174_v19 = vld [vmem:[#allocation2 + $0xe8] sm:$0xff]  ;;  %v149_v31 = vld [vmem:[#allocation2 + $0x20] sm:$0xff]  ;;  %v271_v35 = vld [vmem:[#allocation2 + $0x3f0] sm:$0xff] }
  0xa3   :  { %650 = vmatpush.msrb.mxu0 %v262_v33  ;;  %673 = vmatpush.msrb.mxu1 %v390_v34  ;;  %v302_v20 = vld [vmem:[#allocation2 + $0x4e8] sm:$0xff]  ;;  %v277_v32 = vld [vmem:[#allocation2 + $0x420] sm:$0xff]  ;;  %v399_v36 = vld [vmem:[#allocation2 + $0x7f0] sm:$0xff] }
  0xa4   :  { %v1761_v45 = vmax.f32 %v116_v39, 0.0  ;;  %v1763_v46 = vmax.f32 %v139_v40, 0.0  ;;  %605 = vmatpush.msra.mxu2 %v253_v37  ;;  %628 = vmatpush.msra.mxu3 %v381_v38  ;;  %v286_v30 = vld [vmem:[#allocation2 + $0x468] sm:$0xff]  ;;  %v272_v37 = vld [vmem:[#allocation2 + $0x3f8] sm:$0xff]  ;;  %v263_v39 = vld [vmem:[#allocation2 + $0x3b0] sm:$0xff] }
  0xa5   :  { %651 = vmatpush.msrb.mxu0 %v254_v41  ;;  %674 = vmatpush.msrb.mxu1 %v382_v42  ;;  %v150_v33 = vld [vmem:[#allocation2 + $0x28] sm:$0xff]  ;;  %v400_v38 = vld [vmem:[#allocation2 + $0x7f8] sm:$0xff]  ;;  %v391_v40 = vld [vmem:[#allocation2 + $0x7b0] sm:$0xff] }
  0xa6   :  { %606 = vmatpush.msra.mxu2 %v245_v43  ;;  %629 = vmatpush.msra.mxu3 %v373_v44  ;;  %v278_v34 = vld [vmem:[#allocation2 + $0x428] sm:$0xff]  ;;  %v264_v41 = vld [vmem:[#allocation2 + $0x3b8] sm:$0xff]  ;;  %v255_v43 = vld [vmem:[#allocation2 + $0x370] sm:$0xff] }
  0xa7   :  { %652 = vmatpush.msrb.mxu0 %v246_v47  ;;  %675 = vmatpush.msrb.mxu1 %v374_v48  ;;  %v392_v42 = vld [vmem:[#allocation2 + $0x7b8] sm:$0xff]  ;;  %v383_v44 = vld [vmem:[#allocation2 + $0x770] sm:$0xff] }
  0xa8   :  { %438 = vmatmul.f32.gmra.mxu2 %v1761_v45  ;;  %461 = vmatmul.f32.gmra.mxu3 %v1763_v46  ;;  %v256_v47 = vld [vmem:[#allocation2 + $0x378] sm:$0xff] }
  0xa9   :  { %484 = vmatmul.f32.gmra.mxu0 %v1761_v45  ;;  %507 = vmatmul.f32.gmra.mxu1 %v1763_v46  ;;  %v384_v48 = vld [vmem:[#allocation2 + $0x778] sm:$0xff] }
  0xaa   :  { %607 = vmatpush.msra.mxu2 %v237_v49  ;;  %630 = vmatpush.msra.mxu3 %v365_v50  ;;  %v247_v49 = vld [vmem:[#allocation2 + $0x330] sm:$0xff] }
  0xab   :  { %653 = vmatpush.msrb.mxu0 %v238_v51  ;;  %676 = vmatpush.msrb.mxu1 %v366_v52  ;;  %v375_v50 = vld [vmem:[#allocation2 + $0x730] sm:$0xff]  ;;  %v248_v51 = vld [vmem:[#allocation2 + $0x338] sm:$0xff] }
  0xac   :  { %608 = vmatpush.msra.mxu2 %v229_v53  ;;  %631 = vmatpush.msra.mxu3 %v357_v54  ;;  %v376_v52 = vld [vmem:[#allocation2 + $0x738] sm:$0xff]  ;;  %v239_v53 = vld [vmem:[#allocation2 + $0x2f0] sm:$0xff] }
  0xad   :  { %654 = vmatpush.msrb.mxu0 %v230_v55  ;;  %677 = vmatpush.msrb.mxu1 %v358_v56  ;;  %v367_v54 = vld [vmem:[#allocation2 + $0x6f0] sm:$0xff]  ;;  %v240_v55 = vld [vmem:[#allocation2 + $0x2f8] sm:$0xff] }
  0xae   :  { %609 = vmatpush.msra.mxu2 %v221_v57  ;;  %632 = vmatpush.msra.mxu3 %v349_v58  ;;  %v368_v56 = vld [vmem:[#allocation2 + $0x6f8] sm:$0xff]  ;;  %v231_v57 = vld [vmem:[#allocation2 + $0x2b0] sm:$0xff] }
  0xaf   :  { %655 = vmatpush.msrb.mxu0 %v222_v59  ;;  %678 = vmatpush.msrb.mxu1 %v350_v60  ;;  %v359_v58 = vld [vmem:[#allocation2 + $0x6b0] sm:$0xff]  ;;  %v232_v59 = vld [vmem:[#allocation2 + $0x2b8] sm:$0xff] }
  0xb0   :  { %610 = vmatpush.msra.mxu2 %v213_v61  ;;  %633 = vmatpush.msra.mxu3 %v341_v62  ;;  %v360_v60 = vld [vmem:[#allocation2 + $0x6b8] sm:$0xff]  ;;  %v223_v61 = vld [vmem:[#allocation2 + $0x270] sm:$0xff] }
  0xb1   :  { %656 = vmatpush.msrb.mxu0 %v214_v63  ;;  %679 = vmatpush.msrb.mxu1 %v342_v0  ;;  %v351_v62 = vld [vmem:[#allocation2 + $0x670] sm:$0xff]  ;;  %v224_v63 = vld [vmem:[#allocation2 + $0x278] sm:$0xff] }
  0xb2   :  { %527 = vmatmul.f32.vlgmr.msrb.gmra.mxu2 %v1753_v25  ;;  %550 = vmatmul.f32.vlgmr.msrb.gmra.mxu3 %v1755_v26  ;;  %v352_v0 = vld [vmem:[#allocation2 + $0x678] sm:$0xff] }
  0xb3   :  { %573 = vmatmul.f32.vlgmr.msra.gmra.mxu0 %v1753_v25  ;;  %596 = vmatmul.f32.vlgmr.msra.gmra.mxu1 %v1755_v26 }
  0xb4   :  { %611 = vmatpush.msra.mxu2 %v205_v1  ;;  %634 = vmatpush.msra.mxu3 %v333_v2  ;;  %v215_v1 = vld [vmem:[#allocation2 + $0x230] sm:$0xff] }
  0xb5   :  { %657 = vmatpush.msrb.mxu0 %v206_v3  ;;  %680 = vmatpush.msrb.mxu1 %v334_v4  ;;  %v343_v2 = vld [vmem:[#allocation2 + $0x630] sm:$0xff]  ;;  %v216_v3 = vld [vmem:[#allocation2 + $0x238] sm:$0xff] }
  0xb6   :  { %612 = vmatpush.msra.mxu2 %v197_v5  ;;  %635 = vmatpush.msra.mxu3 %v325_v6  ;;  %v344_v4 = vld [vmem:[#allocation2 + $0x638] sm:$0xff]  ;;  %v207_v5 = vld [vmem:[#allocation2 + $0x1f0] sm:$0xff] }
  0xb7   :  { %658 = vmatpush.msrb.mxu0 %v198_v7  ;;  %681 = vmatpush.msrb.mxu1 %v326_v8  ;;  %v335_v6 = vld [vmem:[#allocation2 + $0x5f0] sm:$0xff]  ;;  %v208_v7 = vld [vmem:[#allocation2 + $0x1f8] sm:$0xff] }
  0xb8   :  { %613 = vmatpush.msra.mxu2 %v189_v9  ;;  %636 = vmatpush.msra.mxu3 %v317_v10  ;;  %v336_v8 = vld [vmem:[#allocation2 + $0x5f8] sm:$0xff]  ;;  %v199_v9 = vld [vmem:[#allocation2 + $0x1b0] sm:$0xff] }
  0xb9   :  { %659 = vmatpush.msrb.mxu0 %v190_v11  ;;  %682 = vmatpush.msrb.mxu1 %v318_v12  ;;  %v327_v10 = vld [vmem:[#allocation2 + $0x5b0] sm:$0xff]  ;;  %v200_v11 = vld [vmem:[#allocation2 + $0x1b8] sm:$0xff] }
  0xba   :  { %614 = vmatpush.msra.mxu2 %v181_v13  ;;  %637 = vmatpush.msra.mxu3 %v309_v14  ;;  %v328_v12 = vld [vmem:[#allocation2 + $0x5b8] sm:$0xff]  ;;  %v191_v13 = vld [vmem:[#allocation2 + $0x170] sm:$0xff] }
  0xbb   :  { %660 = vmatpush.msrb.mxu0 %v182_v15  ;;  %683 = vmatpush.msrb.mxu1 %v310_v16  ;;  %v319_v14 = vld [vmem:[#allocation2 + $0x570] sm:$0xff]  ;;  %v192_v15 = vld [vmem:[#allocation2 + $0x178] sm:$0xff] }
  0xbc   :  { %530 = vmatmul.f32.gmra.mxu2 %v1761_v45  ;;  %553 = vmatmul.f32.gmra.mxu3 %v1763_v46  ;;  %v320_v16 = vld [vmem:[#allocation2 + $0x578] sm:$0xff] }
  0xbd   :  { %576 = vmatmul.f32.gmra.mxu0 %v1761_v45  ;;  %599 = vmatmul.f32.gmra.mxu1 %v1763_v46 }
  0xbe   :  { %615 = vmatpush.msra.mxu2 %v173_v17  ;;  %638 = vmatpush.msra.mxu3 %v301_v18  ;;  %v183_v17 = vld [vmem:[#allocation2 + $0x130] sm:$0xff] }
  0xbf   :  { %661 = vmatpush.msrb.mxu0 %v174_v19  ;;  %684 = vmatpush.msrb.mxu1 %v302_v20  ;;  %v311_v18 = vld [vmem:[#allocation2 + $0x530] sm:$0xff]  ;;  %v184_v19 = vld [vmem:[#allocation2 + $0x138] sm:$0xff] }
  0xc0   :  { %616 = vmatpush.msra.mxu2 %v165_v21  ;;  %639 = vmatpush.msra.mxu3 %v293_v22  ;;  %v312_v20 = vld [vmem:[#allocation2 + $0x538] sm:$0xff]  ;;  %v175_v21 = vld [vmem:[#allocation2 + $0xf0] sm:$0xff] }
  0xc1   :  { %662 = vmatpush.msrb.mxu0 %v166_v23  ;;  %685 = vmatpush.msrb.mxu1 %v294_v24  ;;  %v303_v22 = vld [vmem:[#allocation2 + $0x4f0] sm:$0xff]  ;;  %v176_v23 = vld [vmem:[#allocation2 + $0xf8] sm:$0xff] }
  0xc2   :  { %617 = vmatpush.msra.mxu2 %v157_v27  ;;  %640 = vmatpush.msra.mxu3 %v285_v28  ;;  %v304_v24 = vld [vmem:[#allocation2 + $0x4f8] sm:$0xff]  ;;  %v167_v27 = vld [vmem:[#allocation2 + $0xb0] sm:$0xff] }
  0xc3   :  { %663 = vmatpush.msrb.mxu0 %v158_v29  ;;  %686 = vmatpush.msrb.mxu1 %v286_v30  ;;  %v295_v28 = vld [vmem:[#allocation2 + $0x4b0] sm:$0xff]  ;;  %v168_v29 = vld [vmem:[#allocation2 + $0xb8] sm:$0xff] }
  0xc4   :  { %618 = vmatpush.msra.mxu2 %v149_v31  ;;  %641 = vmatpush.msra.mxu3 %v277_v32  ;;  %v296_v30 = vld [vmem:[#allocation2 + $0x4b8] sm:$0xff]  ;;  %v159_v31 = vld [vmem:[#allocation2 + $0x70] sm:$0xff] }
  0xc5   :  { %664 = vmatpush.msrb.mxu0 %v150_v33  ;;  %687 = vmatpush.msrb.mxu1 %v278_v34  ;;  %v287_v32 = vld [vmem:[#allocation2 + $0x470] sm:$0xff]  ;;  %v160_v33 = vld [vmem:[#allocation2 + $0x78] sm:$0xff] }
  0xc6   :  { %695 = vmatpush.msrb.mxu2 %v271_v35  ;;  %718 = vmatpush.msrb.mxu3 %v399_v36  ;;  %v288_v34 = vld [vmem:[#allocation2 + $0x478] sm:$0xff]  ;;  %v151_v35 = vld [vmem:[#allocation2 + $0x30] sm:$0xff] }
  0xc7   :  { %741 = vmatpush.msra.mxu0 %v272_v37  ;;  %764 = vmatpush.msra.mxu1 %v400_v38  ;;  %v279_v36 = vld [vmem:[#allocation2 + $0x430] sm:$0xff]  ;;  %v152_v37 = vld [vmem:[#allocation2 + $0x38] sm:$0xff] }
  0xc8   :  { %619 = vmatmul.f32.vlgmr.msra.gmra.mxu2 %v1753_v25  ;;  %642 = vmatmul.f32.vlgmr.msra.gmra.mxu3 %v1755_v26  ;;  %v280_v38 = vld [vmem:[#allocation2 + $0x438] sm:$0xff] }
  0xc9   :  { %665 = vmatmul.f32.vlgmr.msrb.gmra.mxu0 %v1753_v25  ;;  %688 = vmatmul.f32.vlgmr.msrb.gmra.mxu1 %v1755_v26 }
  0xca   :  { %696 = vmatpush.msrb.mxu2 %v263_v39  ;;  %719 = vmatpush.msrb.mxu3 %v391_v40  ;;  %v865_v39 = vld [vmem:[#allocation4 + $0x1f0] sm:$0xff] }
  0xcb   :  { %742 = vmatpush.msra.mxu0 %v264_v41  ;;  %765 = vmatpush.msra.mxu1 %v392_v42  ;;  %v833_v40 = vld [vmem:[#allocation4 + $0xf0] sm:$0xff]  ;;  %v863_v41 = vld [vmem:[#allocation4 + $0x1e0] sm:$0xff] }
  0xcc   :  { %697 = vmatpush.msrb.mxu2 %v255_v43  ;;  %720 = vmatpush.msrb.mxu3 %v383_v44  ;;  %v831_v42 = vld [vmem:[#allocation4 + $0xe0] sm:$0xff]  ;;  %v929_v43 = vld [vmem:[#allocation4 + $0x3f0] sm:$0xff] }
  0xcd   :  { %743 = vmatpush.msra.mxu0 %v256_v47  ;;  %766 = vmatpush.msra.mxu1 %v384_v48  ;;  %v861_v44 = vld [vmem:[#allocation4 + $0x1d0] sm:$0xff]  ;;  %v927_v48 = vld [vmem:[#allocation4 + $0x3e0] sm:$0xff] }
  0xce   :  { %698 = vmatpush.msrb.mxu2 %v247_v49  ;;  %721 = vmatpush.msrb.mxu3 %v375_v50  ;;  %v829_v47 = vld [vmem:[#allocation4 + $0xd0] sm:$0xff]  ;;  %v859_v50 = vld [vmem:[#allocation4 + $0x1c0] sm:$0xff] }
  0xcf   :  { %744 = vmatpush.msra.mxu0 %v248_v51  ;;  %767 = vmatpush.msra.mxu1 %v376_v52  ;;  %v925_v49 = vld [vmem:[#allocation4 + $0x3d0] sm:$0xff]  ;;  %v827_v51 = vld [vmem:[#allocation4 + $0xc0] sm:$0xff] }
  0xd0   :  { %699 = vmatpush.msrb.mxu2 %v239_v53  ;;  %722 = vmatpush.msrb.mxu3 %v367_v54  ;;  %v857_v52 = vld [vmem:[#allocation4 + $0x1b0] sm:$0xff]  ;;  %v895_v54 = vld [vmem:[#allocation4 + $0x2e0] sm:$0xff] }
  0xd1   :  { %745 = vmatpush.msra.mxu0 %v240_v55  ;;  %768 = vmatpush.msra.mxu1 %v368_v56  ;;  %v825_v53 = vld [vmem:[#allocation4 + $0xb0] sm:$0xff]  ;;  %v855_v56 = vld [vmem:[#allocation4 + $0x1a0] sm:$0xff] }
  0xd2   :  { %622 = vmatmul.f32.gmra.mxu2 %v1761_v45  ;;  %645 = vmatmul.f32.gmra.mxu3 %v1763_v46  ;;  %v921_v55 = vld [vmem:[#allocation4 + $0x3b0] sm:$0xff] }
  0xd3   :  { %668 = vmatmul.f32.gmra.mxu0 %v1761_v45  ;;  %691 = vmatmul.f32.gmra.mxu1 %v1763_v46 }
  0xd4   :  { %700 = vmatpush.msrb.mxu2 %v231_v57  ;;  %723 = vmatpush.msrb.mxu3 %v359_v58  ;;  %v823_v57 = vld [vmem:[#allocation4 + $0xa0] sm:$0xff]  ;;  %v893_v58 = vld [vmem:[#allocation4 + $0x2d0] sm:$0xff] }
  0xd5   :  { %746 = vmatpush.msra.mxu0 %v232_v59  ;;  %769 = vmatpush.msra.mxu1 %v360_v60  ;;  %v919_v59 = vld [vmem:[#allocation4 + $0x3a0] sm:$0xff]  ;;  %v853_v60 = vld [vmem:[#allocation4 + $0x190] sm:$0xff] }
  0xd6   :  { %701 = vmatpush.msrb.mxu2 %v223_v61  ;;  %724 = vmatpush.msrb.mxu3 %v351_v62  ;;  %v821_v61 = vld [vmem:[#allocation4 + $0x90] sm:$0xff]  ;;  %v851_v62 = vld [vmem:[#allocation4 + $0x180] sm:$0xff] }
  0xd7   :  { %747 = vmatpush.msra.mxu0 %v224_v63  ;;  %770 = vmatpush.msra.mxu1 %v352_v0  ;;  %v819_v63 = vld [vmem:[#allocation4 + $0x80] sm:$0xff]  ;;  %v889_v0 = vld [vmem:[#allocation4 + $0x2b0] sm:$0xff] }
  0xd8   :  { %702 = vmatpush.msrb.mxu2 %v215_v1  ;;  %725 = vmatpush.msrb.mxu3 %v343_v2  ;;  %v915_v1 = vld [vmem:[#allocation4 + $0x380] sm:$0xff]  ;;  %v849_v2 = vld [vmem:[#allocation4 + $0x170] sm:$0xff] }
  0xd9   :  { %748 = vmatpush.msra.mxu0 %v216_v3  ;;  %771 = vmatpush.msra.mxu1 %v344_v4  ;;  %v817_v3 = vld [vmem:[#allocation4 + $0x70] sm:$0xff]  ;;  %v887_v4 = vld [vmem:[#allocation4 + $0x2a0] sm:$0xff] }
  0xda   :  { %703 = vmatpush.msrb.mxu2 %v207_v5  ;;  %726 = vmatpush.msrb.mxu3 %v335_v6  ;;  %v913_v5 = vld [vmem:[#allocation4 + $0x370] sm:$0xff]  ;;  %v847_v6 = vld [vmem:[#allocation4 + $0x160] sm:$0xff] }
  0xdb   :  { %749 = vmatpush.msra.mxu0 %v208_v7  ;;  %772 = vmatpush.msra.mxu1 %v336_v8  ;;  %v815_v7 = vld [vmem:[#allocation4 + $0x60] sm:$0xff]  ;;  %v885_v8 = vld [vmem:[#allocation4 + $0x290] sm:$0xff] }
  0xdc   :  { %704 = vmatpush.msrb.mxu2 %v199_v9  ;;  %727 = vmatpush.msrb.mxu3 %v327_v10  ;;  %v911_v9 = vld [vmem:[#allocation4 + $0x360] sm:$0xff]  ;;  %v845_v10 = vld [vmem:[#allocation4 + $0x150] sm:$0xff] }
  0xdd   :  { %750 = vmatpush.msra.mxu0 %v200_v11  ;;  %773 = vmatpush.msra.mxu1 %v328_v12  ;;  %v813_v11 = vld [vmem:[#allocation4 + $0x50] sm:$0xff]  ;;  %v883_v12 = vld [vmem:[#allocation4 + $0x280] sm:$0xff] }
  0xde   :  { %705 = vmatpush.msrb.mxu2 %v191_v13  ;;  %728 = vmatpush.msrb.mxu3 %v319_v14  ;;  %v909_v13 = vld [vmem:[#allocation4 + $0x350] sm:$0xff]  ;;  %v843_v14 = vld [vmem:[#allocation4 + $0x140] sm:$0xff] }
  0xdf   :  { %751 = vmatpush.msra.mxu0 %v192_v15  ;;  %774 = vmatpush.msra.mxu1 %v320_v16  ;;  %v811_v15 = vld [vmem:[#allocation4 + $0x40] sm:$0xff]  ;;  %v881_v16 = vld [vmem:[#allocation4 + $0x270] sm:$0xff] }
  0xe0   :  { %706 = vmatpush.msrb.mxu2 %v183_v17  ;;  %729 = vmatpush.msrb.mxu3 %v311_v18  ;;  %v907_v17 = vld [vmem:[#allocation4 + $0x340] sm:$0xff]  ;;  %v841_v18 = vld [vmem:[#allocation4 + $0x130] sm:$0xff] }
  0xe1   :  { %752 = vmatpush.msra.mxu0 %v184_v19  ;;  %775 = vmatpush.msra.mxu1 %v312_v20  ;;  %v809_v19 = vld [vmem:[#allocation4 + $0x30] sm:$0xff]  ;;  %v879_v20 = vld [vmem:[#allocation4 + $0x260] sm:$0xff] }
  0xe2   :  { %707 = vmatpush.msrb.mxu2 %v175_v21  ;;  %730 = vmatpush.msrb.mxu3 %v303_v22  ;;  %v905_v21 = vld [vmem:[#allocation4 + $0x330] sm:$0xff]  ;;  %v839_v22 = vld [vmem:[#allocation4 + $0x120] sm:$0xff] }
  0xe3   :  { %753 = vmatpush.msra.mxu0 %v176_v23  ;;  %776 = vmatpush.msra.mxu1 %v304_v24  ;;  %v807_v23 = vld [vmem:[#allocation4 + $0x20] sm:$0xff]  ;;  %v877_v24 = vld [vmem:[#allocation4 + $0x250] sm:$0xff] }
  0xe4   :  { %708 = vmatpush.msrb.mxu2 %v167_v27  ;;  %731 = vmatpush.msrb.mxu3 %v295_v28  ;;  %v903_v27 = vld [vmem:[#allocation4 + $0x320] sm:$0xff]  ;;  %v837_v28 = vld [vmem:[#allocation4 + $0x110] sm:$0xff] }
  0xe5   :  { %754 = vmatpush.msra.mxu0 %v168_v29  ;;  %777 = vmatpush.msra.mxu1 %v296_v30  ;;  %v805_v29 = vld [vmem:[#allocation4 + $0x10] sm:$0xff]  ;;  %v875_v30 = vld [vmem:[#allocation4 + $0x240] sm:$0xff] }
  0xe6   :  { %709 = vmatpush.msrb.mxu2 %v159_v31  ;;  %732 = vmatpush.msrb.mxu3 %v287_v32  ;;  %v901_v31 = vld [vmem:[#allocation4 + $0x310] sm:$0xff]  ;;  %v835_v32 = vld [vmem:[#allocation4 + $0x100] sm:$0xff] }
  0xe7   :  { %755 = vmatpush.msra.mxu0 %v160_v33  ;;  %778 = vmatpush.msra.mxu1 %v288_v34  ;;  %v803_v33 = vld [vmem:[#allocation4] sm:$0xff]  ;;  %v993_v34 = vld [vmem:[#allocation4 + $0x5f0] sm:$0xff] }
  0xe8   :  { %710 = vmatpush.msrb.mxu2 %v151_v35  ;;  %733 = vmatpush.msrb.mxu3 %v279_v36  ;;  %v961_v35 = vld [vmem:[#allocation4 + $0x4f0] sm:$0xff] }
  0xe9   :  { %756 = vmatpush.msra.mxu0 %v152_v37  ;;  %779 = vmatpush.msra.mxu1 %v280_v38  ;;  %v873_v36 = vld [vmem:[#allocation4 + $0x230] sm:$0xff]  ;;  %v899_v37 = vld [vmem:[#allocation4 + $0x300] sm:$0xff] }
  0xea   :  { %711 = vmatmul.f32.vlgmr.msrb.gmra.mxu2 %v1753_v25  ;;  %734 = vmatmul.f32.vlgmr.msrb.gmra.mxu3 %v1755_v26  ;;  %v991_v38 = vld [vmem:[#allocation4 + $0x5e0] sm:$0xff] }
  0xeb   :  { %757 = vmatmul.f32.vlgmr.msra.gmra.mxu0 %v1753_v25  ;;  %780 = vmatmul.f32.vlgmr.msra.gmra.mxu1 %v1755_v26  ;;  %v897_v25 = vld [vmem:[#allocation4 + $0x2f0] sm:$0xff]  ;;  %v923_v26 = vld [vmem:[#allocation4 + $0x3c0] sm:$0xff] }
  0xec   :  { %1088 = vmatpush.msra.mxu3 %v865_v39  ;;  %1065 = vmatpush.msra.mxu2 %v833_v40  ;;  %v959_v39 = vld [vmem:[#allocation4 + $0x4e0] sm:$0xff]  ;;  %v1057_v40 = vld [vmem:[#allocation4 + $0x7f0] sm:$0xff] }
  0xed   :  { %1134 = vmatpush.msrb.mxu1 %v929_v43  ;;  %1111 = vmatpush.msrb.mxu0 %v897_v25  ;;  %v957_v43 = vld [vmem:[#allocation4 + $0x4d0] sm:$0xff] }
  0xee   :  { %1089 = vmatpush.msra.mxu3 %v863_v41  ;;  %1066 = vmatpush.msra.mxu2 %v831_v42  ;;  %v871_v41 = vld [vmem:[#allocation4 + $0x220] sm:$0xff]  ;;  %v989_v42 = vld [vmem:[#allocation4 + $0x5d0] sm:$0xff] }
  0xef   :  { %1135 = vmatpush.msrb.mxu1 %v927_v48  ;;  %1112 = vmatpush.msrb.mxu0 %v895_v54  ;;  %v987_v48 = vld [vmem:[#allocation4 + $0x5c0] sm:$0xff]  ;;  %v985_v25 = vld [vmem:[#allocation4 + $0x5b0] sm:$0xff] }
  0xf0   :  { %1090 = vmatpush.msra.mxu3 %v861_v44  ;;  %1067 = vmatpush.msra.mxu2 %v829_v47  ;;  %v1055_v44 = vld [vmem:[#allocation4 + $0x7e0] sm:$0xff]  ;;  %v869_v47 = vld [vmem:[#allocation4 + $0x210] sm:$0xff] }
  0xf1   :  { %1136 = vmatpush.msrb.mxu1 %v925_v49  ;;  %1113 = vmatpush.msrb.mxu0 %v893_v58  ;;  %v955_v49 = vld [vmem:[#allocation4 + $0x4c0] sm:$0xff]  ;;  %v981_v58 = vld [vmem:[#allocation4 + $0x590] sm:$0xff] }
  0xf2   :  { %714 = vmatmul.f32.gmra.mxu2 %v1761_v45  ;;  %737 = vmatmul.f32.gmra.mxu3 %v1763_v46  ;;  %v983_v54 = vld [vmem:[#allocation4 + $0x5a0] sm:$0xff] }
  0xf3   :  { %760 = vmatmul.f32.gmra.mxu0 %v1761_v45  ;;  %783 = vmatmul.f32.gmra.mxu1 %v1763_v46  ;;  %v891_v45 = vld [vmem:[#allocation4 + $0x2c0] sm:$0xff]  ;;  %v917_v46 = vld [vmem:[#allocation4 + $0x390] sm:$0xff] }
  0xf4   :  { %1091 = vmatpush.msra.mxu3 %v859_v50  ;;  %1068 = vmatpush.msra.mxu2 %v827_v51  ;;  %v1053_v50 = vld [vmem:[#allocation4 + $0x7d0] sm:$0xff]  ;;  %v867_v51 = vld [vmem:[#allocation4 + $0x200] sm:$0xff] }
  0xf5   :  { %1137 = vmatpush.msrb.mxu1 %v923_v26  ;;  %1114 = vmatpush.msrb.mxu0 %v891_v45  ;;  %v953_v26 = vld [vmem:[#allocation4 + $0x4b0] sm:$0xff]  ;;  %v1047_v45 = vld [vmem:[#allocation4 + $0x7a0] sm:$0xff] }
  0xf6   :  { %1092 = vmatpush.msra.mxu3 %v857_v52  ;;  %1069 = vmatpush.msra.mxu2 %v825_v53  ;;  %v1025_v52 = vld [vmem:[#allocation4 + $0x6f0] sm:$0xff]  ;;  %v1051_v53 = vld [vmem:[#allocation4 + $0x7c0] sm:$0xff] }
  0xf7   :  { %1138 = vmatpush.msrb.mxu1 %v921_v55  ;;  %1115 = vmatpush.msrb.mxu0 %v889_v0  ;;  %v951_v55 = vld [vmem:[#allocation4 + $0x4a0] sm:$0xff] }
  0xf8   :  { %1093 = vmatpush.msra.mxu3 %v855_v56  ;;  %1070 = vmatpush.msra.mxu2 %v823_v57  ;;  %v1023_v56 = vld [vmem:[#allocation4 + $0x6e0] sm:$0xff]  ;;  %v1049_v57 = vld [vmem:[#allocation4 + $0x7b0] sm:$0xff] }
  0xf9   :  { %1139 = vmatpush.msrb.mxu1 %v919_v59  ;;  %1116 = vmatpush.msrb.mxu0 %v887_v4  ;;  %v949_v59 = vld [vmem:[#allocation4 + $0x490] sm:$0xff]  ;;  %v1019_v0 = vld [vmem:[#allocation4 + $0x6c0] sm:$0xff] }
  0xfa   :  { %1094 = vmatpush.msra.mxu3 %v853_v60  ;;  %1071 = vmatpush.msra.mxu2 %v821_v61  ;;  %v1796_v60 = vld [vmem:[%s2051_s4] sm:$0xff]  ;;  %v1021_v61 = vld [vmem:[#allocation4 + $0x6d0] sm:$0xff] }
  0xfb   :  { %1140 = vmatpush.msrb.mxu1 %v917_v46  ;;  %1117 = vmatpush.msrb.mxu0 %v885_v8  ;;  %v979_v46 = vld [vmem:[#allocation4 + $0x580] sm:$0xff]  ;;  %v1017_v4 = vld [vmem:[#allocation4 + $0x6b0] sm:$0xff] }
  0xfc   :  { %1095 = vmatpush.msra.mxu3 %v851_v62  ;;  %1072 = vmatpush.msra.mxu2 %v819_v63  ;;  %v947_v62 = vld [vmem:[#allocation4 + $0x480] sm:$0xff]  ;;  %v404_v63 = vperm.slane %v1796_v60, 1 }
  0xfd   :  { %1141 = vmatpush.msrb.mxu1 %v915_v1  ;;  %1118 = vmatpush.msrb.mxu0 %v883_v12  ;;  %v1045_v1 = vld [vmem:[#allocation4 + $0x790] sm:$0xff]  ;;  %v943_v8 = vld [vmem:[#allocation4 + $0x460] sm:$0xff] }
  0xfe   :  { %1096 = vmatpush.msra.mxu3 %v849_v2  ;;  %1073 = vmatpush.msra.mxu2 %v817_v3  ;;  %v977_v2 = vld [vmem:[#allocation4 + $0x570] sm:$0xff] }
  0xff   :  { %1142 = vmatpush.msrb.mxu1 %v913_v5  ;;  %1119 = vmatpush.msrb.mxu0 %v881_v16  ;;  %v945_v3 = vld [vmem:[#allocation4 + $0x470] sm:$0xff]  ;;  %v1043_v5 = vld [vmem:[#allocation4 + $0x780] sm:$0xff] }
 0x100   :  { %1097 = vmatpush.msra.mxu3 %v847_v6  ;;  %1074 = vmatpush.msra.mxu2 %v815_v7  ;;  %v975_v6 = vld [vmem:[#allocation4 + $0x560] sm:$0xff]  ;;  %v941_v12 = vld [vmem:[#allocation4 + $0x450] sm:$0xff] }
 0x101   :  { %1143 = vmatpush.msrb.mxu1 %v911_v9  ;;  %1120 = vmatpush.msrb.mxu0 %v879_v20  ;;  %v1015_v16 = vld [vmem:[#allocation4 + $0x6a0] sm:$0xff] }
 0x102   :  { %1098 = vmatpush.msra.mxu3 %v845_v10  ;;  %1075 = vmatpush.msra.mxu2 %v813_v11  ;;  %v973_v10 = vld [vmem:[#allocation4 + $0x550] sm:$0xff]  ;;  %v1039_v20 = vld [vmem:[#allocation4 + $0x760] sm:$0xff] }
 0x103   :  { %1144 = vmatpush.msrb.mxu1 %v909_v13  ;;  %1121 = vmatpush.msrb.mxu0 %v877_v24  ;;  %v403_v13 = vperm.slane %v1796_v60, 0  ;;  %v969_v24 = vld [vmem:[#allocation4 + $0x530] sm:$0xff] }
 0x104   :  { %1099 = vmatpush.msra.mxu3 %v843_v14  ;;  %1076 = vmatpush.msra.mxu2 %v811_v15  ;;  %v971_v15 = vld [vmem:[#allocation4 + $0x540] sm:$0xff] }
 0x105   :  { %1145 = vmatpush.msrb.mxu1 %v907_v17  ;;  %1122 = vmatpush.msrb.mxu0 %v875_v30  ;;  %v1041_v17 = vld [vmem:[#allocation4 + $0x770] sm:$0xff] }
 0x106   :  { %1100 = vmatpush.msra.mxu3 %v841_v18  ;;  %1077 = vmatpush.msra.mxu2 %v809_v19  ;;  %v939_v18 = vld [vmem:[#allocation4 + $0x440] sm:$0xff]  ;;  %v1013_v19 = vld [vmem:[#allocation4 + $0x690] sm:$0xff] }
 0x107   :  { %1146 = vmatpush.msrb.mxu1 %v905_v21  ;;  %1123 = vmatpush.msrb.mxu0 %v873_v36  ;;  %v1037_v30 = vld [vmem:[#allocation4 + $0x750] sm:$0xff] }
 0x108   :  { %1101 = vmatpush.msra.mxu3 %v839_v22  ;;  %1078 = vmatpush.msra.mxu2 %v807_v23  ;;  %v1011_v23 = vld [vmem:[#allocation4 + $0x680] sm:$0xff] }
 0x109   :  { %1147 = vmatpush.msrb.mxu1 %v903_v27  ;;  %1124 = vmatpush.msrb.mxu0 %v871_v41 }
 0x10a   :  { %1102 = vmatpush.msra.mxu3 %v837_v28  ;;  %1079 = vmatpush.msra.mxu2 %v805_v29  ;;  %v937_v28 = vld [vmem:[#allocation4 + $0x430] sm:$0xff] }
 0x10b   :  { %1148 = vmatpush.msrb.mxu1 %v901_v31  ;;  %1125 = vmatpush.msrb.mxu0 %v869_v47  ;;  %v967_v31 = vld [vmem:[#allocation4 + $0x520] sm:$0xff] }
 0x10c   :  { %1103 = vmatpush.msra.mxu3 %v835_v32  ;;  %1080 = vmatpush.msra.mxu2 %v803_v33  ;;  %v935_v33 = vld [vmem:[#allocation4 + $0x420] sm:$0xff] }
 0x10d   :  { %1149 = vmatpush.msrb.mxu1 %v899_v37  ;;  %1126 = vmatpush.msrb.mxu0 %v867_v51  ;;  %v965_v37 = vld [vmem:[#allocation4 + $0x510] sm:$0xff] }
 0x10e   :  { %1180 = vmatpush.msrb.mxu3 %v993_v34  ;;  %1157 = vmatpush.msrb.mxu2 %v961_v35  ;;  %v1009_v34 = vld [vmem:[#allocation4 + $0x670] sm:$0xff]  ;;  %v1035_v35 = vld [vmem:[#allocation4 + $0x740] sm:$0xff] }
 0x10f   :  { %1226 = vmatpush.msra.mxu1 %v1057_v40  ;;  %1203 = vmatpush.msra.mxu0 %v1025_v52  ;;  %v832_v52 = vld [vmem:[#allocation4 + $0xe8] sm:$0xff] }
 0x110   :  { %1181 = vmatpush.msrb.mxu3 %v991_v38  ;;  %1158 = vmatpush.msrb.mxu2 %v959_v39  ;;  %v933_v39 = vld [vmem:[#allocation4 + $0x410] sm:$0xff] }
 0x111   :  { %1227 = vmatpush.msra.mxu1 %v1055_v44  ;;  %1204 = vmatpush.msra.mxu0 %v1023_v56  ;;  %v931_v44 = vld [vmem:[#allocation4 + $0x400] sm:$0xff] }
 0x112   :  { %1182 = vmatpush.msrb.mxu3 %v989_v42  ;;  %1159 = vmatpush.msrb.mxu2 %v957_v43  ;;  %v963_v42 = vld [vmem:[#allocation4 + $0x500] sm:$0xff]  ;;  %v866_v43 = vld [vmem:[#allocation4 + $0x1f8] sm:$0xff] }
 0x113   :  { %1228 = vmatpush.msra.mxu1 %v1053_v50  ;;  %1205 = vmatpush.msra.mxu0 %v1021_v61  ;;  %v1033_v50 = vld [vmem:[#allocation4 + $0x730] sm:$0xff]  ;;  %v1003_v56 = vld [vmem:[#allocation4 + $0x640] sm:$0xff]  ;;  %v830_v61 = vld [vmem:[#allocation4 + $0xd8] sm:$0xff] }
 0x114   :  { %1183 = vmatpush.msrb.mxu3 %v987_v48  ;;  %1160 = vmatpush.msrb.mxu2 %v955_v49  ;;  %v834_v48 = vld [vmem:[#allocation4 + $0xf8] sm:$0xff]  ;;  %v1007_v49 = vld [vmem:[#allocation4 + $0x660] sm:$0xff] }
 0x115   :  { %1229 = vmatpush.msra.mxu1 %v1051_v53  ;;  %1206 = vmatpush.msra.mxu0 %v1019_v0  ;;  %v1005_v53 = vld [vmem:[#allocation4 + $0x650] sm:$0xff] }
 0x116   :  { %1184 = vmatpush.msrb.mxu3 %v985_v25  ;;  %1161 = vmatpush.msrb.mxu2 %v953_v26  ;;  %v864_v25 = vld [vmem:[#allocation4 + $0x1e8] sm:$0xff]  ;;  %v1001_v0 = vld [vmem:[#allocation4 + $0x630] sm:$0xff] }
 0x117   :  { %1230 = vmatpush.msra.mxu1 %v1049_v57  ;;  %1207 = vmatpush.msra.mxu0 %v1017_v4  ;;  %v862_v57 = vld [vmem:[#allocation4 + $0x1d8] sm:$0xff] }
 0x118   :  { %1185 = vmatpush.msrb.mxu3 %v983_v54  ;;  %1162 = vmatpush.msrb.mxu2 %v951_v55  ;;  %v1031_v55 = vld [vmem:[#allocation4 + $0x720] sm:$0xff] }
 0x119   :  { %1231 = vmatpush.msra.mxu1 %v1047_v45  ;;  %1208 = vmatpush.msra.mxu0 %v1015_v16  ;;  %v854_v16 = vld [vmem:[#allocation4 + $0x198] sm:$0xff] }
 0x11a   :  { %1186 = vmatpush.msrb.mxu3 %v981_v58  ;;  %1163 = vmatpush.msrb.mxu2 %v949_v59  ;;  %v406_v59 = vperm.slane %v1796_v60, 3 }
 0x11b   :  { %1232 = vmatpush.msra.mxu1 %v1045_v1  ;;  %1209 = vmatpush.msra.mxu0 %v1013_v19 }
 0x11c   :  { %1187 = vmatpush.msrb.mxu3 %v979_v46  ;;  %1164 = vmatpush.msrb.mxu2 %v947_v62  ;;  %v482_v7 = vpop.f32.mrf.mxu0  ;;  %v505_v11 = vpop.f32.mrf.mxu1  ;;  %v1029_v46 = vld [vmem:[#allocation4 + $0x710] sm:$0xff]  ;;  %v860_v62 = vld [vmem:[#allocation4 + $0x1c8] sm:$0xff] }
 0x11d   :  { %v483_v9 = vadd.f32 %v482_v7, %v404_v63  ;;  %1233 = vmatpush.msra.mxu1 %v1043_v5  ;;  %1210 = vmatpush.msra.mxu0 %v1011_v23  ;;  %v858_v5 = vld [vmem:[#allocation4 + $0x1b8] sm:$0xff] }
 0x11e   :  { %1188 = vmatpush.msrb.mxu3 %v977_v2  ;;  %1165 = vmatpush.msrb.mxu2 %v945_v3  ;;  %v1027_v3 = vld [vmem:[#allocation4 + $0x700] sm:$0xff] }
 0x11f   :  { %v1802_v14 = vadd.f32 %v505_v11, %v483_v9  ;;  %1234 = vmatpush.msra.mxu1 %v1041_v17  ;;  %1211 = vmatpush.msra.mxu0 %v1009_v34  ;;  %v999_v9 = vld [vmem:[#allocation4 + $0x620] sm:$0xff]  ;;  %v856_v11 = vld [vmem:[#allocation4 + $0x1a8] sm:$0xff]  ;;  %v818_v34 = vld [vmem:[#allocation4 + $0x78] sm:$0xff] }
 0x120   :  { %1189 = vmatpush.msrb.mxu3 %v975_v6  ;;  %1166 = vmatpush.msrb.mxu2 %v943_v8  ;;  %v826_v6 = vld [vmem:[#allocation4 + $0xb8] sm:$0xff]  ;;  %v405_v8 = vperm.slane %v1796_v60, 2 }
 0x121   :  { %v788_v21 = vmax.f32 %v1802_v14, 0.0  ;;  %v436_v22 = vpop.f32.mrf.mxu2  ;;  %1235 = vmatpush.msra.mxu1 %v1039_v20  ;;  %v459_v29 = vpop.f32.mrf.mxu3  ;;  %1212 = vmatpush.msra.mxu0 %v1007_v49  ;;  %v930_v20 = vld [vmem:[#allocation4 + $0x3f8] sm:$0xff]  ;;  %v410_v14 = vperm.slane %v1796_v60, 7 }
 0x122   :  { %1190 = vmatpush.msrb.mxu3 %v973_v10  ;;  %1167 = vmatpush.msrb.mxu2 %v941_v12  ;;  %v437_v27 = vadd.f32 %v436_v22, %v403_v13  ;;  %v824_v12 = vld [vmem:[#allocation4 + $0xa8] sm:$0xff]  ;;  %v995_v22 = vld [vmem:[#allocation4 + $0x600] sm:$0xff]  ;;  %v814_v49 = vld [vmem:[#allocation4 + $0x58] sm:$0xff] }
 0x123   :  { %1104 = vmatmul.f32.vlgmr.msra.gmra.mxu3 %v788_v21  ;;  %1236 = vmatpush.msra.mxu1 %v1037_v30  ;;  %v850_v30 = vld [vmem:[#allocation4 + $0x178] sm:$0xff] }
 0x124   :  { %1191 = vmatpush.msrb.mxu3 %v971_v15  ;;  %1168 = vmatpush.msrb.mxu2 %v939_v18  ;;  %v1807_v32 = vadd.f32 %v459_v29, %v437_v27  ;;  %v822_v18 = vld [vmem:[#allocation4 + $0x98] sm:$0xff]  ;;  %v820_v27 = vld [vmem:[#allocation4 + $0x88] sm:$0xff] }
 0x125   :  { %1237 = vmatpush.msra.mxu1 %v1035_v35  ;;  %1213 = vmatpush.msra.mxu0 %v1005_v53  ;;  %v928_v29 = vld [vmem:[#allocation4 + $0x3e8] sm:$0xff]  ;;  %v926_v35 = vld [vmem:[#allocation4 + $0x3d8] sm:$0xff] }
 0x126   :  { %1192 = vmatpush.msrb.mxu3 %v969_v24  ;;  %1169 = vmatpush.msrb.mxu2 %v937_v28  ;;  %v787_v36 = vmax.f32 %v1807_v32, 0.0  ;;  %v485_v38 = vpop.f32.mrf.mxu0  ;;  %v508_v41 = vpop.f32.mrf.mxu1  ;;  %v852_v24 = vld [vmem:[#allocation4 + $0x188] sm:$0xff] }
 0x127   :  { %v486_v40 = vadd.f32 %v485_v38, %v404_v63  ;;  %1238 = vmatpush.msra.mxu1 %v1033_v50  ;;  %v828_v63 = vld [vmem:[#allocation4 + $0xc8] sm:$0xff]  ;;  %1214 = vmatpush.msra.mxu0 %v1003_v56 }
 0x128   :  { %1193 = vmatpush.msrb.mxu3 %v967_v31  ;;  %1170 = vmatpush.msrb.mxu2 %v935_v33  ;;  %v848_v38 = vld [vmem:[#allocation4 + $0x168] sm:$0xff] }
 0x129   :  { %1081 = vmatmul.f32.vlgmr.msra.gmra.mxu2 %v787_v36  ;;  %v1816_v47 = vadd.f32 %v508_v41, %v486_v40  ;;  %1239 = vmatpush.msra.mxu1 %v1031_v55  ;;  %v816_v41 = vld [vmem:[#allocation4 + $0x68] sm:$0xff]  ;;  %v894_v55 = vld [vmem:[#allocation4 + $0x2d8] sm:$0xff] }
 0x12a   :  { %1194 = vmatpush.msrb.mxu3 %v965_v37  ;;  %1171 = vmatpush.msrb.mxu2 %v933_v39  ;;  %v898_v39 = vld [vmem:[#allocation4 + $0x2f8] sm:$0xff]  ;;  %v964_v32 = vld [vmem:[#allocation4 + $0x508] sm:$0xff] }
 0x12b   :  { %v796_v51 = vmax.f32 %v1816_v47, 0.0  ;;  %v439_v26 = vpop.f32.mrf.mxu2  ;;  %v462_v58 = vpop.f32.mrf.mxu3  ;;  %1240 = vmatpush.msra.mxu1 %v1029_v46  ;;  %1215 = vmatpush.msra.mxu0 %v1001_v0  ;;  %v892_v46 = vld [vmem:[#allocation4 + $0x2c8] sm:$0xff] }
 0x12c   :  { %1195 = vmatpush.msrb.mxu3 %v963_v42  ;;  %1172 = vmatpush.msrb.mxu2 %v931_v44  ;;  %v440_v54 = vadd.f32 %v439_v26, %v403_v13  ;;  %v997_v13 = vld [vmem:[#allocation4 + $0x610] sm:$0xff]  ;;  %v924_v42 = vld [vmem:[#allocation4 + $0x3c8] sm:$0xff]  ;;  %v846_v44 = vld [vmem:[#allocation4 + $0x158] sm:$0xff] }
 0x12d   :  { %1107 = vmatmul.f32.gmra.mxu3 %v796_v51  ;;  %1241 = vmatpush.msra.mxu1 %v1027_v3  ;;  %v844_v26 = vld [vmem:[#allocation4 + $0x148] sm:$0xff]  ;;  %v918_v3 = vld [vmem:[#allocation4 + $0x398] sm:$0xff] }
 0x12e   :  { %1272 = vmatpush.msra.mxu3 %v866_v43  ;;  %1249 = vmatpush.msra.mxu2 %v834_v48  ;;  %v1824_v45 = vadd.f32 %v462_v58, %v440_v54  ;;  %v896_v48 = vld [vmem:[#allocation4 + $0x2e8] sm:$0xff] }
 0x12f   :  { %1216 = vmatpush.msra.mxu0 %v999_v9  ;;  %v812_v54 = vld [vmem:[#allocation4 + $0x48] sm:$0xff] }
 0x130   :  { %1273 = vmatpush.msra.mxu3 %v864_v25  ;;  %1250 = vmatpush.msra.mxu2 %v832_v52  ;;  %v795_v1 = vmax.f32 %v1824_v45, 0.0  ;;  %v574_v2 = vpop.f32.mrf.mxu0  ;;  %v597_v7 = vpop.f32.mrf.mxu1  ;;  %v922_v52 = vld [vmem:[#allocation4 + $0x3b8] sm:$0xff]  ;;  %v920_v58 = vld [vmem:[#allocation4 + $0x3a8] sm:$0xff] }
 0x131   :  { %v575_v4 = vadd.f32 %v574_v2, %v406_v59  ;;  %1217 = vmatpush.msra.mxu0 %v997_v13  ;;  %v808_v2 = vld [vmem:[#allocation4 + $0x28] sm:$0xff] }
 0x132   :  { %1274 = vmatpush.msra.mxu3 %v862_v57  ;;  %1251 = vmatpush.msra.mxu2 %v830_v61  ;;  %v842_v57 = vld [vmem:[#allocation4 + $0x138] sm:$0xff] }
 0x133   :  { %v1830_v10 = vadd.f32 %v597_v7, %v575_v4  ;;  %1084 = vmatmul.f32.gmra.mxu2 %v795_v1  ;;  %1218 = vmatpush.msra.mxu0 %v995_v22  ;;  %v810_v61 = vld [vmem:[#allocation4 + $0x38] sm:$0xff]  ;;  %v912_v22 = vld [vmem:[#allocation4 + $0x368] sm:$0xff] }
 0x134   :  { %1275 = vmatpush.msra.mxu3 %v860_v62  ;;  %1252 = vmatpush.msra.mxu2 %v828_v63  ;;  %v408_v62 = vperm.slane %v1796_v60, 5  ;;  %v840_v63 = vld [vmem:[#allocation4 + $0x128] sm:$0xff]  ;;  %v838_v4 = vld [vmem:[#allocation4 + $0x118] sm:$0xff] }
 0x135   :  { %v790_v15 = vmax.f32 %v1830_v10, 0.0  ;;  %v528_v17 = vpop.f32.mrf.mxu2  ;;  %v551_v23 = vpop.f32.mrf.mxu3  ;;  %v806_v7 = vld [vmem:[#allocation4 + $0x18] sm:$0xff] }
 0x136   :  { %1276 = vmatpush.msra.mxu3 %v858_v5  ;;  %1253 = vmatpush.msra.mxu2 %v826_v6  ;;  %v529_v19 = vadd.f32 %v528_v17, %v405_v8  ;;  %v890_v5 = vld [vmem:[#allocation4 + $0x2b8] sm:$0xff]  ;;  %v804_v17 = vld [vmem:[#allocation4 + $0x8] sm:$0xff] }
 0x137   :  { %1150 = vmatmul.f32.vlgmr.msrb.gmra.mxu1 %v790_v15  ;;  %v1006_v10 = vld [vmem:[#allocation4 + $0x658] sm:$0xff] }
 0x138   :  { %1277 = vmatpush.msra.mxu3 %v856_v11  ;;  %1254 = vmatpush.msra.mxu2 %v824_v12  ;;  %v1837_v28 = vadd.f32 %v551_v23, %v529_v19  ;;  %v836_v11 = vld [vmem:[#allocation4 + $0x108] sm:$0xff] }
 0x139   :  { %1318 = vmatpush.msrb.mxu1 %v930_v20  ;;  %v888_v12 = vld [vmem:[#allocation4 + $0x2a8] sm:$0xff]  ;;  %v886_v20 = vld [vmem:[#allocation4 + $0x298] sm:$0xff] }
 0x13a   :  { %1278 = vmatpush.msra.mxu3 %v854_v16  ;;  %1255 = vmatpush.msra.mxu2 %v822_v18  ;;  %v789_v31 = vmax.f32 %v1837_v28, 0.0  ;;  %v577_v33 = vpop.f32.mrf.mxu0  ;;  %v600_v40 = vpop.f32.mrf.mxu1  ;;  %v407_v16 = vperm.slane %v1796_v60, 4  ;;  %v914_v18 = vld [vmem:[#allocation4 + $0x378] sm:$0xff]  ;;  %v1000_v28 = vld [vmem:[#allocation4 + $0x628] sm:$0xff] }
 0x13b   :  { %v578_v37 = vadd.f32 %v577_v33, %v406_v59  ;;  %1319 = vmatpush.msrb.mxu1 %v928_v29  ;;  %v884_v29 = vld [vmem:[#allocation4 + $0x288] sm:$0xff]  ;;  %v910_v33 = vld [vmem:[#allocation4 + $0x358] sm:$0xff] }
 0x13c   :  { %1279 = vmatpush.msra.mxu3 %v852_v24  ;;  %1256 = vmatpush.msra.mxu2 %v820_v27  ;;  %v994_v27 = vld [vmem:[#allocation4 + $0x5f8] sm:$0xff] }
 0x13d   :  { %1127 = vmatmul.f32.vlgmr.msrb.gmra.mxu0 %v789_v31  ;;  %v1844_v43 = vadd.f32 %v600_v40, %v578_v37  ;;  %1320 = vmatpush.msrb.mxu1 %v926_v35  ;;  %v992_v35 = vld [vmem:[#allocation4 + $0x5e8] sm:$0xff]  ;;  %v882_v37 = vld [vmem:[#allocation4 + $0x278] sm:$0xff] }
 0x13e   :  { %1280 = vmatpush.msra.mxu3 %v850_v30  ;;  %1257 = vmatpush.msra.mxu2 %v818_v34  ;;  %v990_v40 = vld [vmem:[#allocation4 + $0x5d8] sm:$0xff] }
 0x13f   :  { %1295 = vmatpush.msrb.mxu0 %v898_v39  ;;  %v798_v50 = vmax.f32 %v1844_v43, 0.0  ;;  %v531_v25 = vpop.f32.mrf.mxu2  ;;  %1321 = vmatpush.msrb.mxu1 %v924_v42  ;;  %v554_v56 = vpop.f32.mrf.mxu3  ;;  %v908_v39 = vld [vmem:[#allocation4 + $0x348] sm:$0xff] }
 0x140   :  { %1281 = vmatpush.msra.mxu3 %v848_v38  ;;  %1258 = vmatpush.msra.mxu2 %v816_v41  ;;  %v532_v53 = vadd.f32 %v531_v25, %v405_v8  ;;  %v916_v8 = vld [vmem:[#allocation4 + $0x388] sm:$0xff] }
 0x141   :  { %1296 = vmatpush.msrb.mxu0 %v896_v48  ;;  %1153 = vmatmul.f32.gmra.mxu1 %v798_v50  ;;  %v880_v48 = vld [vmem:[#allocation4 + $0x268] sm:$0xff] }
 0x142   :  { %1282 = vmatpush.msra.mxu3 %v846_v44  ;;  %1259 = vmatpush.msra.mxu2 %v814_v49  ;;  %v1849_v59 = vadd.f32 %v554_v56, %v532_v53  ;;  %v962_v44 = vld [vmem:[#allocation4 + $0x4f8] sm:$0xff]  ;;  %v988_v25 = vld [vmem:[#allocation4 + $0x5c8] sm:$0xff] }
 0x143   :  { %1322 = vmatpush.msrb.mxu1 %v922_v52  ;;  %1297 = vmatpush.msrb.mxu0 %v894_v55  ;;  %v960_v53 = vld [vmem:[#allocation4 + $0x4e8] sm:$0xff]  ;;  %v986_v56 = vld [vmem:[#allocation4 + $0x5b8] sm:$0xff] }
 0x144   :  { %1283 = vmatpush.msra.mxu3 %v844_v26  ;;  %1260 = vmatpush.msra.mxu2 %v812_v54  ;;  %v797_v0 = vmax.f32 %v1849_v59, 0.0  ;;  %v906_v26 = vld [vmem:[#allocation4 + $0x338] sm:$0xff]  ;;  %v996_v43 = vld [vmem:[#allocation4 + $0x608] sm:$0xff]  ;;  %v1447_v59 = vld [vmem:[%s2054_s7 + $0x70] sm:$0xff] }
 0x145   :  { %1323 = vmatpush.msrb.mxu1 %v920_v58  ;;  %1298 = vmatpush.msrb.mxu0 %v892_v46  ;;  %v878_v54 = vld [vmem:[#allocation4 + $0x258] sm:$0xff] }
 0x146   :  { %1284 = vmatpush.msra.mxu3 %v842_v57  ;;  %1261 = vmatpush.msra.mxu2 %v810_v61  ;;  %v666_v6 = vpop.f32.mrf.mxu0  ;;  %v689_v13 = vpop.f32.mrf.mxu1  ;;  %v904_v57 = vld [vmem:[#allocation4 + $0x328] sm:$0xff]  ;;  %v958_v58 = vld [vmem:[#allocation4 + $0x4d8] sm:$0xff] }
 0x147   :  { %1130 = vmatmul.f32.gmra.mxu0 %v797_v0  ;;  %v667_v9 = vadd.f32 %v666_v6, %v408_v62  ;;  %1324 = vmatpush.msrb.mxu1 %v918_v3  ;;  %v956_v3 = vld [vmem:[#allocation4 + $0x4c8] sm:$0xff]  ;;  %v982_v6 = vld [vmem:[#allocation4 + $0x598] sm:$0xff] }
 0x148   :  { %1285 = vmatpush.msra.mxu3 %v840_v63  ;;  %1262 = vmatpush.msra.mxu2 %v808_v2  ;;  %v876_v63 = vld [vmem:[#allocation4 + $0x248] sm:$0xff] }
 0x149   :  { %1299 = vmatpush.msrb.mxu0 %v890_v5  ;;  %v1856_v19 = vadd.f32 %v689_v13, %v667_v9  ;;  %1325 = vmatpush.msrb.mxu1 %v916_v8  ;;  %v954_v9 = vld [vmem:[#allocation4 + $0x4b8] sm:$0xff] }
 0x14a   :  { %1286 = vmatpush.msra.mxu3 %v838_v4  ;;  %1263 = vmatpush.msra.mxu2 %v806_v7  ;;  %v902_v4 = vld [vmem:[#allocation4 + $0x318] sm:$0xff] }
 0x14b   :  { %1300 = vmatpush.msrb.mxu0 %v888_v12  ;;  %v792_v23 = vmax.f32 %v1856_v19, 0.0  ;;  %v620_v24 = vpop.f32.mrf.mxu2  ;;  %1326 = vmatpush.msrb.mxu1 %v914_v18  ;;  %v643_v34 = vpop.f32.mrf.mxu3  ;;  %v874_v7 = vld [vmem:[#allocation4 + $0x238] sm:$0xff]  ;;  %v980_v12 = vld [vmem:[#allocation4 + $0x588] sm:$0xff] }
 0x14c   :  { %1287 = vmatpush.msra.mxu3 %v836_v11  ;;  %1264 = vmatpush.msra.mxu2 %v804_v17  ;;  %v621_v30 = vadd.f32 %v620_v24, %v407_v16  ;;  %v900_v11 = vld [vmem:[#allocation4 + $0x308] sm:$0xff]  ;;  %v978_v18 = vld [vmem:[#allocation4 + $0x578] sm:$0xff] }
 0x14d   :  { %1301 = vmatpush.msrb.mxu0 %v886_v20  ;;  %1196 = vmatmul.f32.vlgmr.msrb.gmra.mxu3 %v792_v23  ;;  %v872_v17 = vld [vmem:[#allocation4 + $0x228] sm:$0xff]  ;;  %v950_v20 = vld [vmem:[#allocation4 + $0x498] sm:$0xff] }
 0x14e   :  { %1327 = vmatpush.msrb.mxu1 %v912_v22  ;;  %v1861_v38 = vadd.f32 %v643_v34, %v621_v30  ;;  %1364 = vmatpush.msrb.mxu3 %v994_v27  ;;  %v976_v22 = vld [vmem:[#allocation4 + $0x568] sm:$0xff]  ;;  %v870_v24 = vld [vmem:[#allocation4 + $0x218] sm:$0xff] }
 0x14f   :  { %1302 = vmatpush.msrb.mxu0 %v884_v29  ;;  %v948_v27 = vld [vmem:[#allocation4 + $0x488] sm:$0xff]  ;;  %v974_v29 = vld [vmem:[#allocation4 + $0x558] sm:$0xff] }
 0x150   :  { %1328 = vmatpush.msrb.mxu1 %v910_v33  ;;  %v791_v41 = vmax.f32 %v1861_v38, 0.0  ;;  %v669_v42 = vpop.f32.mrf.mxu0  ;;  %1365 = vmatpush.msrb.mxu3 %v992_v35  ;;  %v692_v52 = vpop.f32.mrf.mxu1  ;;  %v868_v30 = vld [vmem:[#allocation4 + $0x208] sm:$0xff]  ;;  %v946_v33 = vld [vmem:[#allocation4 + $0x478] sm:$0xff] }
 0x151   :  { %1303 = vmatpush.msrb.mxu0 %v882_v37  ;;  %v670_v49 = vadd.f32 %v669_v42, %v408_v62  ;;  %v984_v62 = vld [vmem:[#allocation4 + $0x5a8] sm:$0xff]  ;;  %v970_v37 = vld [vmem:[#allocation4 + $0x538] sm:$0xff] }
 0x152   :  { %1329 = vmatpush.msrb.mxu1 %v908_v39  ;;  %1366 = vmatpush.msrb.mxu3 %v990_v40  ;;  %v972_v34 = vld [vmem:[#allocation4 + $0x548] sm:$0xff]  ;;  %v942_v39 = vld [vmem:[#allocation4 + $0x458] sm:$0xff] }
 0x153   :  { %1173 = vmatmul.f32.vlgmr.msrb.gmra.mxu2 %v791_v41  ;;  %v1866_v55 = vadd.f32 %v692_v52, %v670_v49  ;;  %1304 = vmatpush.msrb.mxu0 %v880_v48  ;;  %v944_v35 = vld [vmem:[#allocation4 + $0x468] sm:$0xff]  ;;  %v966_v42 = vld [vmem:[#allocation4 + $0x518] sm:$0xff] }
 0x154   :  { %1341 = vmatpush.msrb.mxu2 %v962_v44  ;;  %1367 = vmatpush.msrb.mxu3 %v988_v25  ;;  %v940_v40 = vld [vmem:[#allocation4 + $0x448] sm:$0xff]  ;;  %v938_v49 = vld [vmem:[#allocation4 + $0x438] sm:$0xff] }
 0x155   :  { %1330 = vmatpush.msrb.mxu1 %v906_v26  ;;  %v800_v61 = vmax.f32 %v1866_v55, 0.0  ;;  %v623_v46 = vpop.f32.mrf.mxu2  ;;  %1305 = vmatpush.msrb.mxu0 %v878_v54  ;;  %v646_v5 = vpop.f32.mrf.mxu3  ;;  %v936_v26 = vld [vmem:[#allocation4 + $0x428] sm:$0xff]  ;;  %v1058_v54 = vld [vmem:[#allocation4 + $0x7f8] sm:$0xff] }
 0x156   :  { %1342 = vmatpush.msrb.mxu2 %v960_v53  ;;  %v624_v2 = vadd.f32 %v623_v46, %v407_v16  ;;  %1368 = vmatpush.msrb.mxu3 %v986_v56  ;;  %v952_v16 = vld [vmem:[#allocation4 + $0x4a8] sm:$0xff]  ;;  %v934_v56 = vld [vmem:[#allocation4 + $0x418] sm:$0xff] }
 0x157   :  { %1331 = vmatpush.msrb.mxu1 %v904_v57  ;;  %1199 = vmatmul.f32.gmra.mxu3 %v800_v61  ;;  %v1024_v19 = vld [vmem:[#allocation4 + $0x6e8] sm:$0xff] }
 0x158   :  { %1343 = vmatpush.msrb.mxu2 %v958_v58  ;;  %v1871_v8 = vadd.f32 %v646_v5, %v624_v2  ;;  %1369 = vmatpush.msrb.mxu3 %v984_v62  ;;  %v932_v58 = vld [vmem:[#allocation4 + $0x408] sm:$0xff]  ;;  %v1054_v62 = vld [vmem:[#allocation4 + $0x7d8] sm:$0xff] }
 0x159   :  { %1306 = vmatpush.msrb.mxu0 %v876_v63  ;;  %1332 = vmatpush.msrb.mxu1 %v902_v4  ;;  %v1052_v5 = vld [vmem:[#allocation4 + $0x7c8] sm:$0xff] }
 0x15a   :  { %1344 = vmatpush.msrb.mxu2 %v956_v3  ;;  %v799_v13 = vmax.f32 %v1871_v8, 0.0  ;;  %1370 = vmatpush.msrb.mxu3 %v982_v6  ;;  %v1026_v3 = vld [vmem:[#allocation4 + $0x6f8] sm:$0xff]  ;;  %v1040_v55 = vld [vmem:[#allocation4 + $0x768] sm:$0xff] }
 0x15b   :  { %1307 = vmatpush.msrb.mxu0 %v874_v7  ;;  %1333 = vmatpush.msrb.mxu1 %v900_v11  ;;  %v1050_v7 = vld [vmem:[#allocation4 + $0x7b8] sm:$0xff]  ;;  %v1008_v8 = vld [vmem:[#allocation4 + $0x668] sm:$0xff] }
 0x15c   :  { %1345 = vmatpush.msrb.mxu2 %v954_v9  ;;  %1371 = vmatpush.msrb.mxu3 %v980_v12  ;;  %v1022_v11 = vld [vmem:[#allocation4 + $0x6d8] sm:$0xff] }
 0x15d   :  { %1176 = vmatmul.f32.gmra.mxu2 %v799_v13  ;;  %1308 = vmatpush.msrb.mxu0 %v872_v17 }
 0x15e   :  { %1346 = vmatpush.msrb.mxu2 %v952_v16  ;;  %1372 = vmatpush.msrb.mxu3 %v978_v18  ;;  %v1048_v16 = vld [vmem:[#allocation4 + $0x7a8] sm:$0xff] }
 0x15f   :  { %1288 = vmatmul.f32.vlgmr.msra.gmra.mxu3 %v788_v21  ;;  %1309 = vmatpush.msrb.mxu0 %v870_v24  ;;  %v968_v21 = vld [vmem:[#allocation4 + $0x528] sm:$0xff] }
 0x160   :  { %1347 = vmatpush.msrb.mxu2 %v950_v20  ;;  %1373 = vmatpush.msrb.mxu3 %v976_v22  ;;  %v1020_v18 = vld [vmem:[#allocation4 + $0x6c8] sm:$0xff]  ;;  %v1046_v20 = vld [vmem:[#allocation4 + $0x798] sm:$0xff] }
 0x161   :  { %1310 = vmatpush.msrb.mxu0 %v868_v30  ;;  %v1044_v22 = vld [vmem:[#allocation4 + $0x788] sm:$0xff]  ;;  %v1038_v30 = vld [vmem:[#allocation4 + $0x758] sm:$0xff] }
 0x162   :  { %1348 = vmatpush.msrb.mxu2 %v948_v27  ;;  %1374 = vmatpush.msrb.mxu3 %v974_v29  ;;  %v1016_v24 = vld [vmem:[#allocation4 + $0x6a8] sm:$0xff]  ;;  %v1042_v27 = vld [vmem:[#allocation4 + $0x778] sm:$0xff] }
 0x163   :  { %v1014_v29 = vld [vmem:[#allocation4 + $0x698] sm:$0xff] }
 0x164   :  { %1349 = vmatpush.msrb.mxu2 %v946_v33  ;;  %1375 = vmatpush.msrb.mxu3 %v972_v34  ;;  %v1010_v33 = vld [vmem:[#allocation4 + $0x678] sm:$0xff]  ;;  %v1036_v34 = vld [vmem:[#allocation4 + $0x748] sm:$0xff] }
 0x165   :  { %1265 = vmatmul.f32.vlgmr.msra.gmra.mxu2 %v787_v36  ;;  %v409_v36 = vperm.slane %v1796_v60, 6  ;;  %v1056_v60 = vld [vmem:[#allocation4 + $0x7e8] sm:$0xff] }
 0x166   :  { %1350 = vmatpush.msrb.mxu2 %v944_v35  ;;  %1376 = vmatpush.msrb.mxu3 %v970_v37  ;;  %v1004_v35 = vld [vmem:[#allocation4 + $0x648] sm:$0xff]  ;;  %v1030_v37 = vld [vmem:[#allocation4 + $0x718] sm:$0xff] }
 0x167   :  { %1291 = vmatmul.f32.gmra.mxu3 %v796_v51 }
 0x168   :  { %1351 = vmatpush.msrb.mxu2 %v942_v39  ;;  %v758_v44 = vpop.f32.mrf.mxu0  ;;  %v781_v48 = vpop.f32.mrf.mxu1  ;;  %1377 = vmatpush.msrb.mxu3 %v968_v21  ;;  %v1002_v39 = vld [vmem:[#allocation4 + $0x638] sm:$0xff]  ;;  %v1445_v21 = vld [vmem:[%s2054_s7 + $0x60] sm:$0xff] }
 0x169   :  { %v759_v25 = vadd.f32 %v758_v44, %v410_v14  ;;  %v1442_v44 = vld [vmem:[%s2054_s7 + $0x48] sm:$0xff] }
 0x16a   :  { %1352 = vmatpush.msrb.mxu2 %v940_v40  ;;  %1378 = vmatpush.msrb.mxu3 %v966_v42  ;;  %v1444_v40 = vld [vmem:[%s2054_s7 + $0x58] sm:$0xff]  ;;  %v1443_v42 = vld [vmem:[%s2054_s7 + $0x50] sm:$0xff] }
 0x16b   :  { %v1884_v52 = vadd.f32 %v781_v48, %v759_v25  ;;  %v1441_v48 = vld [vmem:[%s2054_s7 + $0x40] sm:$0xff]  ;;  %v1439_v25 = vld [vmem:[%s2054_s7 + $0x30] sm:$0xff] }
 0x16c   :  { %1353 = vmatpush.msrb.mxu2 %v938_v49  ;;  %1379 = vmatpush.msrb.mxu3 %v964_v32  ;;  %v1440_v49 = vld [vmem:[%s2054_s7 + $0x38] sm:$0xff]  ;;  %v1438_v32 = vld [vmem:[%s2054_s7 + $0x28] sm:$0xff] }
 0x16d   :  { %1268 = vmatmul.f32.gmra.mxu2 %v795_v1  ;;  %v794_v47 = vmax.f32 %v1884_v52, 0.0  ;;  %v712_v51 = vpop.f32.mrf.mxu2  ;;  %v735_v53 = vpop.f32.mrf.mxu3 }
 0x16e   :  { %1354 = vmatpush.msrb.mxu2 %v936_v26  ;;  %v713_v57 = vadd.f32 %v712_v51, %v409_v36  ;;  %v1436_v26 = vld [vmem:[%s2054_s7 + $0x18] sm:$0xff]  ;;  %v1434_v51 = vld [vmem:[%s2054_s7 + $0x8] sm:$0xff] }
 0x16f   :  { %1242 = vmatmul.f32.vlgmr.msra.gmra.mxu1 %v794_v47  ;;  %1380 = vmatmul.f32.vlgmr.msrb.gmra.mxu3 %v792_v23 }
 0x170   :  { %v1893_v46 = vadd.f32 %v735_v53, %v713_v57  ;;  %v761_v45 = vpop.f32.mrf.mxu0  ;;  %1410 = vmatpush.msra.mxu1 %v1058_v54  ;;  %1355 = vmatpush.msrb.mxu2 %v934_v56  ;;  %v784_v2 = vpop.f32.mrf.mxu1  ;;  %v1433_v53 = vld [vmem:[%s2054_s7] sm:$0xff]  ;;  %v1464_v56 = vld [vmem:[%s2054_s7 + $0xf8] sm:$0xff] }
 0x171   :  { %v762_v1 = vadd.f32 %v761_v45, %v410_v14  ;;  %v1028_v14 = vld [vmem:[#allocation4 + $0x708] sm:$0xff]  ;;  %1492 = vmatpush.msra.mxu3 %v1464_v56  ;;  %v1977_v57 = vld [vmem:[%s2053_s6] sm:$0x3] }
 0x172   :  { %v793_v63 = vmax.f32 %v1893_v46, 0.0  ;;  %1411 = vmatpush.msra.mxu1 %v1056_v60  ;;  %1356 = vmatpush.msrb.mxu2 %v932_v58  ;;  %v1463_v58 = vld [vmem:[%s2054_s7 + $0xf0] sm:$0xff]  ;;  %v1462_v45 = vld [vmem:[%s2054_s7 + $0xe8] sm:$0xff] }
 0x173   :  { %v1896_v4 = vadd.f32 %v784_v2, %v762_v1  ;;  %1493 = vmatpush.msra.mxu3 %v1463_v58  ;;  %v1061_v1 = vperm.slane %v1977_v57, 0  ;;  %v1460_v2 = vld [vmem:[%s2054_s7 + $0xd8] sm:$0xff] }
 0x174   :  { %1412 = vmatpush.msra.mxu1 %v1054_v62  ;;  %1219 = vmatmul.f32.vlgmr.msra.gmra.mxu0 %v793_v63  ;;  %v1461_v62 = vld [vmem:[%s2054_s7 + $0xe0] sm:$0xff] }
 0x175   :  { %v802_v23 = vmax.f32 %v1896_v4, 0.0  ;;  %v715_v6 = vpop.f32.mrf.mxu2  ;;  %1387 = vmatpush.msra.mxu0 %v1026_v3  ;;  %1357 = vmatmul.f32.vlgmr.msrb.gmra.mxu2 %v791_v41  ;;  %v738_v12 = vpop.f32.mrf.mxu3  ;;  %v1018_v41 = vld [vmem:[#allocation4 + $0x6b8] sm:$0xff] }
 0x176   :  { %v716_v9 = vadd.f32 %v715_v6, %v409_v36  ;;  %1413 = vmatpush.msra.mxu1 %v1052_v5  ;;  %v1437_v36 = vld [vmem:[%s2054_s7 + $0x20] sm:$0xff]  ;;  %1494 = vmatpush.msra.mxu3 %v1462_v45 }
 0x177   :  { %1245 = vmatmul.f32.gmra.mxu1 %v802_v23  ;;  %1388 = vmatpush.msra.mxu0 %v1024_v19  ;;  %v1459_v19 = vld [vmem:[%s2054_s7 + $0xd0] sm:$0xff] }
 0x178   :  { %v739_v17 = vadd.f32 %v738_v12, %v716_v9  ;;  %1414 = vmatpush.msra.mxu1 %v1050_v7  ;;  %1383 = vmatmul.f32.gmra.mxu3 %v800_v61  ;;  %v1012_v61 = vld [vmem:[#allocation4 + $0x688] sm:$0xff]  ;;  %v1457_v9 = vld [vmem:[%s2054_s7 + $0xc0] sm:$0xff]  ;;  %v1456_v12 = vld [vmem:[%s2054_s7 + $0xb8] sm:$0xff] }
 0x179   :  { %1389 = vmatpush.msra.mxu0 %v1022_v11  ;;  %1495 = vmatpush.msra.mxu3 %v1461_v62 }
 0x17a   :  { %v801_v38 = vmax.f32 %v739_v17, 0.0  ;;  %1415 = vmatpush.msra.mxu1 %v1048_v16 }
 0x17b   :  { %1390 = vmatpush.msra.mxu0 %v1020_v18  ;;  %1496 = vmatpush.msra.mxu3 %v1460_v2 }
 0x17c   :  { %1416 = vmatpush.msra.mxu1 %v1046_v20  ;;  %1222 = vmatmul.f32.gmra.mxu0 %v801_v38  ;;  %v1455_v20 = vld [vmem:[%s2054_s7 + $0xb0] sm:$0xff] }
 0x17d   :  { %1391 = vmatpush.msra.mxu0 %v1018_v41  ;;  %1360 = vmatmul.f32.gmra.mxu2 %v799_v13  ;;  %v1034_v13 = vld [vmem:[#allocation4 + $0x738] sm:$0xff] }
 0x17e   :  { %1417 = vmatpush.msra.mxu1 %v1044_v22  ;;  %1497 = vmatpush.msra.mxu3 %v1459_v19 }
 0x17f   :  { %1334 = vmatmul.f32.vlgmr.msrb.gmra.mxu1 %v790_v15  ;;  %1392 = vmatpush.msra.mxu0 %v1016_v24  ;;  %v1032_v15 = vld [vmem:[#allocation4 + $0x728] sm:$0xff] }
 0x180   :  { %1418 = vmatpush.msra.mxu1 %v1042_v27  ;;  %v1454_v24 = vld [vmem:[%s2054_s7 + $0xa8] sm:$0xff] }
 0x181   :  { %1393 = vmatpush.msra.mxu0 %v1014_v29 }
 0x182   :  { %1419 = vmatpush.msra.mxu1 %v1040_v55  ;;  %v1453_v55 = vld [vmem:[%s2054_s7 + $0xa0] sm:$0xff] }
 0x183   :  { %1394 = vmatpush.msra.mxu0 %v1012_v61  ;;  %v1452_v61 = vld [vmem:[%s2054_s7 + $0x98] sm:$0xff] }
 0x184   :  { %1420 = vmatpush.msra.mxu1 %v1038_v30  ;;  %1311 = vmatmul.f32.vlgmr.msrb.gmra.mxu0 %v789_v31  ;;  %v998_v31 = vld [vmem:[#allocation4 + $0x618] sm:$0xff] }
 0x185   :  { %1395 = vmatpush.msra.mxu0 %v1010_v33 }
 0x186   :  { %1421 = vmatpush.msra.mxu1 %v1036_v34 }
 0x187   :  { %1337 = vmatmul.f32.gmra.mxu1 %v798_v50  ;;  %1396 = vmatpush.msra.mxu0 %v1008_v8  ;;  %v1448_v50 = vld [vmem:[%s2054_s7 + $0x78] sm:$0xff] }
 0x188   :  { %1422 = vmatpush.msra.mxu1 %v1034_v13  ;;  %1469 = vmatpush.msra.mxu2 %v1448_v50  ;;  %v1451_v13 = vld [vmem:[%s2054_s7 + $0x90] sm:$0xff] }
 0x189   :  { %1397 = vmatpush.msra.mxu0 %v1006_v10 }
 0x18a   :  { %1423 = vmatpush.msra.mxu1 %v1032_v15  ;;  %1470 = vmatpush.msra.mxu2 %v1447_v59 }
 0x18b   :  { %1398 = vmatpush.msra.mxu0 %v1004_v35  ;;  %v1450_v35 = vld [vmem:[%s2054_s7 + $0x88] sm:$0xff] }
 0x18c   :  { %1424 = vmatpush.msra.mxu1 %v1030_v37  ;;  %1314 = vmatmul.f32.gmra.mxu0 %v797_v0  ;;  %v1446_v0 = vld [vmem:[%s2054_s7 + $0x68] sm:$0xff] }
 0x18d   :  { %1399 = vmatpush.msra.mxu0 %v1002_v39  ;;  %1471 = vmatpush.msra.mxu2 %v1446_v0  ;;  %v1062_v0 = vperm.slane %v1977_v57, 1 }
 0x18e   :  { %1425 = vmatpush.msra.mxu1 %v1028_v14 }
 0x18f   :  { %1426 = vmatmul.f32.vlgmr.msra.gmra.mxu1 %v794_v47  ;;  %1400 = vmatpush.msra.mxu0 %v1000_v28  ;;  %v1435_v47 = vld [vmem:[%s2054_s7 + $0x10] sm:$0xff]  ;;  %v1449_v28 = vld [vmem:[%s2054_s7 + $0x80] sm:$0xff] }
 0x190   :  { %1472 = vmatpush.msra.mxu2 %v1445_v21 }
 0x191   :  { %1401 = vmatpush.msra.mxu0 %v998_v31 }
 0x192   :  { %1473 = vmatpush.msra.mxu2 %v1444_v40 }
 0x193   :  { %1402 = vmatpush.msra.mxu0 %v996_v43 }
 0x194   :  { %1403 = vmatmul.f32.vlgmr.msra.gmra.mxu0 %v793_v63  ;;  %1474 = vmatpush.msra.mxu2 %v1443_v42 }
 0x196   :  { %1475 = vmatpush.msra.mxu2 %v1442_v44 }
 0x197   :  { %1429 = vmatmul.f32.gmra.mxu1 %v802_v23  ;;  %v1458_v23 = vld [vmem:[%s2054_s7 + $0xc8] sm:$0xff] }
 0x198   :  { %1476 = vmatpush.msra.mxu2 %v1441_v48  ;;  %1498 = vmatpush.msra.mxu3 %v1458_v23 }
 0x19a   :  { %1477 = vmatpush.msra.mxu2 %v1440_v49  ;;  %1499 = vmatpush.msra.mxu3 %v1457_v9 }
 0x19c   :  { %1406 = vmatmul.f32.gmra.mxu0 %v801_v38  ;;  %1478 = vmatpush.msra.mxu2 %v1439_v25 }
 0x19d   :  { %1500 = vmatpush.msra.mxu3 %v1456_v12 }
 0x19e   :  { %1479 = vmatpush.msra.mxu2 %v1438_v32 }
 0x19f   :  { %1501 = vmatpush.msra.mxu3 %v1455_v20 }
 0x1a0   :  { %1480 = vmatpush.msra.mxu2 %v1437_v36 }
 0x1a1   :  { %1502 = vmatpush.msra.mxu3 %v1454_v24 }
 0x1a2   :  { %1481 = vmatpush.msra.mxu2 %v1436_v26 }
 0x1a3   :  { %1503 = vmatpush.msra.mxu3 %v1453_v55 }
 0x1a4   :  { %1482 = vmatpush.msra.mxu2 %v1435_v47 }
 0x1a5   :  { %1504 = vmatpush.msra.mxu3 %v1452_v61 }
 0x1a6   :  { %1483 = vmatpush.msra.mxu2 %v1434_v51  ;;  %v1105_v54 = vpop.f32.mrf.mxu3 }
 0x1a7   :  { %1505 = vmatpush.msra.mxu3 %v1451_v13 }
 0x1a8   :  { %1484 = vmatpush.msra.mxu2 %v1433_v53 }
 0x1a9   :  { %1506 = vmatpush.msra.mxu3 %v1450_v35 }
 0x1ab   :  { %1507 = vmatpush.msra.mxu3 %v1449_v28 }
 0x1ac   :  { %v1082_v52 = vpop.f32.mrf.mxu2 }
 0x1ad   :  { %v1083_v4 = vadd.f32 %v1082_v52, %v1061_v1 }
 0x1af   :  { %v1106_v6 = vadd.f32 %v1105_v54, %v1083_v4 }
 0x1b0   :  { %v1108_v63 = vpop.f32.mrf.mxu3 }
 0x1b4   :  { %v1151_v46 = vpop.f32.mrf.mxu1 }
 0x1b6   :  { %v1085_v60 = vpop.f32.mrf.mxu2 }
 0x1b7   :  { %v1086_v17 = vadd.f32 %v1085_v60, %v1061_v1 }
 0x1b9   :  { %v1109_v38 = vadd.f32 %v1108_v63, %v1086_v17 }
 0x1ba   :  { %v1128_v3 = vpop.f32.mrf.mxu0 }
 0x1bb   :  { %v1129_v16 = vadd.f32 %v1128_v3, %v1106_v6 }
 0x1bd   :  { %v1152_v41 = vadd.f32 %v1151_v46, %v1129_v16 }
 0x1be   :  { %v1154_v7 = vpop.f32.mrf.mxu1 }
 0x1c4   :  { %v1131_v18 = vpop.f32.mrf.mxu0 }
 0x1c5   :  { %v1132_v30 = vadd.f32 %v1131_v18, %v1109_v38 }
 0x1c7   :  { %v1155_v10 = vadd.f32 %v1154_v7, %v1132_v30 }
 0x1d0   :  { %v1197_v11 = vpop.f32.mrf.mxu3 }
 0x1d6   :  { %v1174_v5 = vpop.f32.mrf.mxu2 }
 0x1d7   :  { %v1175_v27 = vadd.f32 %v1174_v5, %v1152_v41 }
 0x1d9   :  { %v1198_v34 = vadd.f32 %v1197_v11, %v1175_v27  ;;  %v1565_v11 = vld [vmem:[%s2055_s8] ss:$0 sm:$0xff] }
 0x1da   :  { %v1200_v33 = vpop.f32.mrf.mxu3 }
 0x1e0   :  { %v1177_v22 = vpop.f32.mrf.mxu2 }
 0x1e1   :  { %v1178_v37 = vadd.f32 %v1177_v22, %v1155_v10 }
 0x1e2   :  { %v1289_v50 = vpop.f32.mrf.mxu3 }
 0x1e3   :  { %v1201_v43 = vadd.f32 %v1200_v33, %v1178_v37 }
 0x1e8   :  { %v1266_v31 = vpop.f32.mrf.mxu2 }
 0x1e9   :  { %v1267_v44 = vadd.f32 %v1266_v31, %v1062_v0 }
 0x1ea   :  { %v1292_v32 = vpop.f32.mrf.mxu3 }
 0x1eb   :  { %v1290_v25 = vadd.f32 %v1289_v50, %v1267_v44 }
 0x1ec   :  { %v1243_v29 = vpop.f32.mrf.mxu1 }
 0x1f0   :  { %v1269_v48 = vpop.f32.mrf.mxu2 }
 0x1f1   :  { %v1220_v8 = vpop.f32.mrf.mxu0  ;;  %v1270_v26 = vadd.f32 %v1269_v48, %v1062_v0 }
 0x1f2   :  { %v1221_v15 = vadd.f32 %v1220_v8, %v1198_v34  ;;  %v1381_v58 = vpop.f32.mrf.mxu3 }
 0x1f3   :  { %v1293_v54 = vadd.f32 %v1292_v32, %v1270_v26 }
 0x1f4   :  { %v1244_v39 = vadd.f32 %v1243_v29, %v1221_v15  ;;  %v1246_v14 = vpop.f32.mrf.mxu1 }
 0x1f6   :  { %1485 = vmatmul.f32.vlgmr.msra.gmra.mxu2 %v1244_v39 }
 0x1f8   :  { %v1358_v51 = vpop.f32.mrf.mxu2 }
 0x1f9   :  { %v1223_v59 = vpop.f32.mrf.mxu0 }
 0x1fa   :  { %v1224_v21 = vadd.f32 %v1223_v59, %v1201_v43 }
 0x1fb   :  { %v1384_v4 = vpop.f32.mrf.mxu3 }
 0x1fc   :  { %v1247_v40 = vadd.f32 %v1246_v14, %v1224_v21  ;;  %v1335_v42 = vpop.f32.mrf.mxu1 }
 0x1fe   :  { %1488 = vmatmul.f32.gmra.mxu2 %v1247_v40 }
 0x200   :  { %v1361_v63 = vpop.f32.mrf.mxu2 }
 0x201   :  { %v1312_v49 = vpop.f32.mrf.mxu0 }
 0x202   :  { %v1313_v36 = vadd.f32 %v1312_v49, %v1290_v25 }
 0x204   :  { %v1338_v52 = vpop.f32.mrf.mxu1  ;;  %v1336_v47 = vadd.f32 %v1335_v42, %v1313_v36 }
 0x206   :  { %v1359_v60 = vadd.f32 %v1358_v51, %v1336_v47 }
 0x208   :  { %v1382_v46 = vadd.f32 %v1381_v58, %v1359_v60 }
 0x209   :  { %v1315_v53 = vpop.f32.mrf.mxu0 }
 0x20a   :  { %v1316_v56 = vadd.f32 %v1315_v53, %v1293_v54 }
 0x20c   :  { %v1339_v57 = vadd.f32 %v1338_v52, %v1316_v56  ;;  %v1427_v45 = vpop.f32.mrf.mxu1 }
 0x20e   :  { %v1362_v3 = vadd.f32 %v1361_v63, %v1339_v57 }
 0x210   :  { %v1385_v5 = vadd.f32 %v1384_v4, %v1362_v3 }
 0x211   :  { %v1404_v1 = vpop.f32.mrf.mxu0 }
 0x212   :  { %v1405_v62 = vadd.f32 %v1404_v1, %v1382_v46 }
 0x214   :  { %v1428_v2 = vadd.f32 %v1427_v45, %v1405_v62  ;;  %v1430_v6 = vpop.f32.mrf.mxu1 }
 0x216   :  { %1508 = vmatmul.f32.vlgmr.msra.gmra.mxu3 %v1428_v2 }
 0x219   :  { %v1407_v19 = vpop.f32.mrf.mxu0 }
 0x21a   :  { %v1408_v23 = vadd.f32 %v1407_v19, %v1385_v5 }
 0x21c   :  { %v1431_v7 = vadd.f32 %v1430_v6, %v1408_v23 }
 0x21e   :  { %1511 = vmatmul.f32.gmra.mxu3 %v1431_v7 }
 0x279   :  { %v1486_v9 = vpop.f32.mrf.mxu2 }
 0x27a   :  { %v1487_v12 = vadd.f32 %v1565_v11, %v1486_v9 }
 0x281   :  { %v1489_v20 = vpop.f32.mrf.mxu2 }
 0x282   :  { %v1490_v38 = vadd.f32 %v1565_v11, %v1489_v20 }
 0x299   :  { %v1509_v16 = vpop.f32.mrf.mxu3 }
 0x29a   :  { %v1510_v17 = vadd.f32 %v1509_v16, %v1487_v12 }
 0x29c   :  { %v1516_v18 = vsel %vm1515_vm1, %v1510_v17, -inf }
 0x29d   :  { %1517 = vmax.xlane.f32.xlu0 %v1516_v18 }
 0x2a1   :  { %v1512_v41 = vpop.f32.mrf.mxu3 }
 0x2a2   :  { %v1513_v22 = vadd.f32 %v1512_v41, %v1490_v38 }
 0x2a4   :  { %v1519_v24 = vsel %vm1515_vm1, %v1513_v22, -inf }
 0x2a5   :  { %1520 = vmax.xlane.f32.xlu0 %v1519_v24 }
 0x310   :  { %v1518_v27 = vpop.xlane.xlu0 %1517 }
 0x311   :  { %v1522_v29 = vsub.f32 %v1510_v17, %v1518_v27 }
 0x313   :  { %v1524_v55 = vmul.f32 1.442695, %v1522_v29 }
 0x315   :  { %1566 = vpow2.f32 %v1524_v55 }
 0x318   :  { %v1521_v61 = vpop.xlane.xlu0 %1520 }
 0x319   :  { %v1523_v30 = vsub.f32 %v1513_v22, %v1521_v61 }
 0x31b   :  { %v1567_v33 = vpop.eup %1566  ;;  %v1526_v34 = vmul.f32 1.442695, %v1523_v30 }
 0x31c   :  { %v1528_v8 = vsel %vm1515_vm1, %v1567_v33, 0.0 }
 0x31d   :  { %1568 = vpow2.f32 %v1526_v34  ;;  %1529 = vadd.xlane.f32.xlu1 %v1528_v8 }
 0x323   :  { %v1569_v13 = vpop.eup %1568 }
 0x324   :  { %v1531_v10 = vsel %vm1515_vm1, %v1569_v13, 0.0 }
 0x325   :  { %1532 = vadd.xlane.f32.xlu1 %v1531_v10 }
 0x390   :  { %v1530_v15 = vpop.xlane.xlu1 %1529 }
 0x391   :  { %1570 = vlog2.f32 %v1530_v15 }
 0x392   :  { %1572 = vtanh.f32 %v1510_v17 }
 0x397   :  { %v1571_v35 = vpop.eup %1570 }
 0x398   :  { %v1535_v37 = vmul.f32 0.6931472, %v1571_v35  ;;  %v1533_v39 = vpop.xlane.xlu1 %1532  ;;  %v1573_v31 = vpop.eup %1572 }
 0x399   :  { %1574 = vlog2.f32 %v1533_v39 }
 0x39a   :  { %v1538_v14 = vadd.f32 %v1535_v37, %v1518_v27  ;;  %1576 = vtanh.f32 %v1513_v22 }
 0x39c   :  { %v1540_v28 = vsub.f32 %v1510_v17, %v1538_v14 }
 0x39e   :  { %1542 = vst.msk [vmem:[%s2056_s9] sm:$0xff] %vm1515_vm1, %v1540_v28 }
 0x39f   :  { %v1575_v43 = vpop.eup %1574  ;;  %1547 = vst.msk [vmem:[%s2056_s9] sm:$0xff] %vm1546_vm2, %v1573_v31 }
 0x3a0   :  { %v1537_v50 = vmul.f32 0.6931472, %v1575_v43  ;;  %v1577_v21 = vpop.eup %1576 }
 0x3a2   :  { %v1539_v59 = vadd.f32 %v1537_v50, %v1521_v61 }
 0x3a4   :  { %v1541_v0 = vsub.f32 %v1513_v22, %v1539_v59 }
 0x3a6   :  { %1543 = vst.msk [vmem:[%s2056_s9 + $0x8] sm:$0xff] %vm1515_vm1, %v1541_v0 }
 0x3a7   :  { %1548 = vst.msk [vmem:[%s2056_s9 + $0x8] sm:$0xff] %vm1546_vm2, %v1577_v21 }
 0x3a8   :  { %1553 = vsyncpa [#allocation3], 1 }
 0x3a9   :  { %1554 = vsyncpa [#allocation5], 1 }

</bundles_post_ra>
